<compile_context>
chip_gen: v6e
topology: v6e:2x2x1
jax: 0.10.0
libtpu: 0.0.40
codegen_flags: <defaults>
</compile_context>

<pallas_src>
import jax
import jax.numpy as jnp
from jax import lax
from jax.experimental import pallas as pl
from jax.experimental.pallas import tpu as pltpu

COMPUTE_DTYPE = jnp.bfloat16   # MXU operand dtype (f32 accumulation inside the kernel)


def _vmem_limit_bytes():
    # Budget VMEM per generation (v7x has 64 MiB physical, v5e/v6e 128 MiB).
    try:
        cap = int(pltpu.get_tpu_info().vmem_capacity_bytes)
    except Exception:
        cap = 64 * 1024 * 1024
    return max(32 * 1024 * 1024, min(cap * 3 // 4, 100 * 1024 * 1024))


# ---------------------------------------------------------------------------
# Pallas kernel: one image per grid step, stride-2 3x3 conv as a 2x2 block conv
# on the space-to-depth input (4 taps, contiguous slices, no strided access).
# ---------------------------------------------------------------------------
def _conv_s2d_kernel(x_ref, w_ref, b_ref, o_ref):
    # x_ref: (Hb, Wb, K)  s2d input for one image (bf16), Hb = Ho+1, Wb = Wo+1
    # w_ref: (4, K, O)    per-tap weights (bf16), tap t = 2*bi + bj
    # b_ref: (1, O)       f32 bias
    # o_ref: (Ho, Wo, O)  output for one image
    Ho, Wo, O = o_ref.shape
    bias = b_ref[...]                                   # (1, O) f32

    def row(i, carry):
        acc = jnp.zeros((Wo, O), jnp.float32)
        for t in range(4):                              # unrolled 2x2 taps
            bi, bj = t // 2, t % 2
            tap = x_ref[i + bi, pl.ds(bj, Wo), :]       # (Wo, K) contiguous slab
            acc = acc + jnp.dot(tap, w_ref[t], preferred_element_type=jnp.float32)
        o_ref[i] = (acc + bias).astype(o_ref.dtype)
        return carry

    lax.fori_loop(0, Ho, row, 0)


# ---------------------------------------------------------------------------
# XLA glue: padded 2x2 space-to-depth layout (all stride handling lives here)
# ---------------------------------------------------------------------------
def _space_to_depth_padded(y_nhwc):
    """NHWC map -> padded s2d layout (B*Hb, Wb, 4C), with
    s2d[b*Hb + p, q, (dr*2+dc)*C + c] == pad(y,1)[b, 2p+dr, 2q+dc, c]."""
    B, H, W, C = y_nhwc.shape
    assert H % 2 == 0 and W % 2 == 0
    Hb, Wb = H // 2 + 1, W // 2 + 1
    yp = jnp.pad(y_nhwc, ((0, 0), (1, 1), (1, 1), (0, 0)))
    yp = yp.reshape(B, Hb, 2, Wb, 2, C)
    yp = jnp.transpose(yp, (0, 1, 3, 2, 4, 5))          # (B, Hb, Wb, 2, 2, C)
    return yp.reshape(B * Hb, Wb, 4 * C), Hb, Wb


def _conv3x3_s2(y_nhwc, w_taps, bias, out_dtype=COMPUTE_DTYPE, extra=None):
    """3x3 / stride-2 / pad-1 conv via the s2d 4-tap formulation.
    `extra` optionally appends channels aligned with tap (0,0) -- used to fuse the
    1x1/stride-16 residual conv into conv4."""
    B, H, W, _ = y_nhwc.shape
    Ho, Wo = H // 2, W // 2
    s2d, Hb, Wb = _space_to_depth_padded(y_nhwc)
    if extra is not None:
        s2d = jnp.concatenate([s2d, extra.astype(s2d.dtype)], axis=-1)
    K = s2d.shape[-1]
    O = w_taps.shape[-1]

    out = pl.pallas_call(
        _conv_s2d_kernel,
        out_shape=jax.ShapeDtypeStruct((B * Ho, Wo, O), out_dtype),
        grid=(B,),
        in_specs=[
            pl.BlockSpec((Hb, Wb, K), lambda b: (b, 0, 0)),   # per-image s2d map (streamed)
            pl.BlockSpec((4, K, O), lambda b: (0, 0, 0)),     # resident tap weights
            pl.BlockSpec((1, O), lambda b: (0, 0)),           # resident f32 bias
        ],
        out_specs=pl.BlockSpec((Ho, Wo, O), lambda b: (b, 0, 0)),
        compiler_params=pltpu.CompilerParams(
            dimension_semantics=("parallel",),
            vmem_limit_bytes=_vmem_limit_bytes(),
        ),
    )(s2d, w_taps, bias)
    return out.reshape(B, Ho, Wo, O)


# ---------------------------------------------------------------------------
# One-time weight repack: OIHW 3x3 -> per-tap (4, 4*I, O) matmul weights
# ---------------------------------------------------------------------------
def prepare_params(params, compute_dtype=COMPUTE_DTYPE):
    def taps(w_oihw, extra_rows=0):
        O, I = w_oihw.shape[0], w_oihw.shape[1]
        w = jnp.transpose(w_oihw.astype(jnp.float32), (2, 3, 1, 0))     # (3,3,I,O)
        w2 = jnp.zeros((2, 2, 4 * I + extra_rows, O), jnp.float32)
        for kh in range(3):
            for kw in range(3):
                bi, dr, bj, dc = kh // 2, kh % 2, kw // 2, kw % 2
                r0 = (dr * 2 + dc) * I
                w2 = w2.at[bi, bj, r0:r0 + I, :].set(w[kh, kw])
            # taps with kh==3 / kw==3 never exist -> those weight rows stay zero
        return w2.reshape(4, 4 * I + extra_rows, O)

    w4, wr = params["w4"], params["wr"]
    O4, I4, cin = w4.shape[0], w4.shape[1], wr.shape[1]
    w4r = taps(w4, extra_rows=cin)
    # residual 1x1 conv weight rides on tap (0,0): rows [4*I4 : 4*I4+cin]
    w4r = w4r.at[0, 4 * I4:, :].set(wr.reshape(O4, cin).astype(jnp.float32).T)

    def b32(b):
        return b.astype(jnp.float32).reshape(1, -1)

    return {
        "w1": taps(params["w1"]).astype(compute_dtype), "b1": b32(params["b1"]),
        "w2": taps(params["w2"]).astype(compute_dtype), "b2": b32(params["b2"]),
        "w3": taps(params["w3"]).astype(compute_dtype), "b3": b32(params["b3"]),
        "w4r": w4r.astype(compute_dtype),
        "b4r": b32(params["b4"] + params["br"]),        # conv4 bias + residual bias, folded
    }


# ---------------------------------------------------------------------------
# ConvPatchEmbedding forward (NCHW in / NCHW out, like the PyTorch module)
# ---------------------------------------------------------------------------
def conv_patch_embedding(x_nchw, prepped):
    B, Cin, H, W = x_nchw.shape
    assert H % 16 == 0 and W % 16 == 0, "residual 1x1/stride-16 branch requires H, W % 16 == 0"
    x = jnp.transpose(x_nchw, (0, 2, 3, 1)).astype(COMPUTE_DTYPE)       # NHWC, bf16 operands

    y = _conv3x3_s2(x, prepped["w1"], prepped["b1"])
    y = _conv3x3_s2(y, prepped["w2"], prepped["b2"])
    y = _conv3x3_s2(y, prepped["w3"], prepped["b3"])

    # residual branch input (1x1 conv, stride 16) fused into conv4 as extra tap-(0,0) channels
    Ho4, Wo4 = H // 16, W // 16
    xr = x[:, ::16, ::16, :]                                            # (B, Ho4, Wo4, Cin)
    xr = jnp.pad(xr, ((0, 0), (0, 1), (0, 1), (0, 0)))                  # pad row/col never read
    xr = xr.reshape(B * (Ho4 + 1), Wo4 + 1, Cin)

    y = _conv3x3_s2(y, prepped["w4r"], prepped["b4r"], out_dtype=jnp.float32, extra=xr)
    return jnp.transpose(y, (0, 3, 1, 2))                               # NHWC -> NCHW


# ---------------------------------------------------------------------------
# References (pure JAX, mirror PyTorch nn.Conv2d semantics) for validation
# ---------------------------------------------------------------------------
def _ref_conv(x, w, b, stride, pad, dtype=None):
    if dtype is not None:
        x = x.astype(dtype)
        w = w.astype(dtype)
    y = lax.conv_general_dilated(
        x, w, (stride, stride), [(pad, pad), (pad, pad)],
        dimension_numbers=("NCHW", "OIHW", "NCHW"),
        preferred_element_type=jnp.float32,
    )
    return y + b[None, :, None, None].astype(jnp.float32)


def ref_forward_f32(x, p):
    res = _ref_conv(x, p["wr"], p["br"], 16, 0)
    y = _ref_conv(x, p["w1"], p["b1"], 2, 1)
    y = _ref_conv(y, p["w2"], p["b2"], 2, 1)
    y = _ref_conv(y, p["w3"], p["b3"], 2, 1)
    y = _ref_conv(y, p["w4"], p["b4"], 2, 1)
    return y + res


def ref_forward_bf16(x, p):
    # Mirrors the kernel path's quantization: bf16 operands, f32 accumulation,
    # bf16 intermediate feature maps, f32 final output.
    res = _ref_conv(x, p["wr"], p["br"], 16, 0, dtype=jnp.bfloat16)
    y = _ref_conv(x, p["w1"], p["b1"], 2, 1, dtype=jnp.bfloat16).astype(jnp.bfloat16)
    y = _ref_conv(y, p["w2"], p["b2"], 2, 1, dtype=jnp.bfloat16).astype(jnp.bfloat16)
    y = _ref_conv(y, p["w3"], p["b3"], 2, 1, dtype=jnp.bfloat16).astype(jnp.bfloat16)
    y = _ref_conv(y, p["w4"], p["b4"], 2, 1, dtype=jnp.bfloat16)
    return y + res


# ---------------------------------------------------------------------------
# Main
# ---------------------------------------------------------------------------
if __name__ == "__main__":
    in_channels, out_channels = 4, 32
    B, H, W = 2, 16, 16

    key = jax.random.PRNGKey(0)
    ks = jax.random.split(key, 11)

    def winit(k, shape, scale=0.05):
        return (scale * jax.random.normal(k, shape)).astype(jnp.float32)

    params = {
        "w1": winit(ks[0], (32, in_channels, 3, 3)),   "b1": winit(ks[1], (32,), 0.01),
        "w2": winit(ks[2], (64, 32, 3, 3)),            "b2": winit(ks[3], (64,), 0.01),
        "w3": winit(ks[4], (128, 64, 3, 3)),           "b3": winit(ks[5], (128,), 0.01),
        "w4": winit(ks[6], (out_channels, 128, 3, 3)), "b4": winit(ks[7], (out_channels,), 0.01),
        "wr": winit(ks[8], (out_channels, in_channels, 1, 1)),
        "br": winit(ks[9], (out_channels,), 0.01),
    }

    x = jax.random.normal(ks[10], (B, in_channels, H, W), dtype=jnp.float32)

    prepped = prepare_params(params)               # one-time weight repack (outside the forward)
    fwd = jax.jit(conv_patch_embedding)

    out = jax.block_until_ready(fwd(x, prepped))
    assert out.shape == (B, out_channels, H // 16, W // 16), out.shape

    # Tight check vs a reference with matching bf16 operand quantization.
    ref_q = jax.block_until_ready(ref_forward_bf16(x, params))
    err_q = float(jnp.max(jnp.abs(out - ref_q)))
    assert jnp.allclose(out, ref_q, rtol=1e-2, atol=1e-2), err_q

    # Loose sanity check vs the pure-f32 PyTorch-equivalent reference (bf16 quantization error).
    ref = jax.block_until_ready(ref_forward_f32(x, params))
    err = float(jnp.max(jnp.abs(out - ref)))
    assert jnp.allclose(out, ref, rtol=1e-1, atol=5e-2), err

    print("KERNEL_OK")
</pallas_src>

<mosaic_0001>
module attributes {stable_mosaic.version = 11 : i64} {
  func.func @_conv_s2d_kernel(%arg0: i32, %arg1: memref<9x9x16xbf16, #tpu.memory_space<vmem>>, %arg2: memref<4x16x32xbf16, #tpu.memory_space<vmem>>, %arg3: memref<1x32xf32, #tpu.memory_space<vmem>>, %arg4: memref<8x8x32xbf16, #tpu.memory_space<vmem>>) attributes {dimension_semantics = [#tpu.dimension_semantics<parallel>], iteration_bounds = array<i64: 2>, scalar_prefetch = 0 : i64, scratch_operands = 0 : i64, tpu.core_type = #tpu.core_type<tc>, window_params = [{transform_indices = @transform_0, window_bounds = array<i64: 9, 9, 16>}, {pipeline_mode = #tpu.pipeline_mode<synchronous>, transform_indices = @transform_1, window_bounds = array<i64: 4, 16, 32>}, {pipeline_mode = #tpu.pipeline_mode<synchronous>, transform_indices = @transform_2, window_bounds = array<i64: 1, 32>}, {transform_indices = @transform_3, window_bounds = array<i64: 8, 8, 32>}]} {
    %c0 = arith.constant 0 : index
    %c0_0 = arith.constant 0 : index
    %0 = vector.load %arg3[%c0, %c0_0] : memref<1x32xf32, #tpu.memory_space<vmem>>, vector<1x32xf32>
    %c0_i32 = arith.constant 0 : i32
    %c8_i32 = arith.constant 8 : i32
    %1 = arith.addi %c0_i32, %c8_i32 : i32
    %c1_i32 = arith.constant 1 : i32
    scf.for %arg5 = %c0_i32 to %1 step %c1_i32  : i32 {
      %cst = arith.constant 0.000000e+00 : f32
      %2 = vector.broadcast %cst : f32 to vector<8x32xf32>
      %c0_i32_2 = arith.constant 0 : i32
      %3 = arith.addi %arg5, %c0_i32_2 : i32
      %4 = arith.index_cast %3 : i32 to index
      %c0_3 = arith.constant 0 : index
      %c0_4 = arith.constant 0 : index
      %5 = vector.load %arg1[%4, %c0_3, %c0_4] : memref<9x9x16xbf16, #tpu.memory_space<vmem>>, vector<1x8x16xbf16>
      %6 = vector.shape_cast %5 : vector<1x8x16xbf16> to vector<8x16xbf16>
      %c0_5 = arith.constant 0 : index
      %c0_6 = arith.constant 0 : index
      %c0_7 = arith.constant 0 : index
      %7 = vector.load %arg2[%c0_5, %c0_6, %c0_7] : memref<4x16x32xbf16, #tpu.memory_space<vmem>>, vector<1x16x32xbf16>
      %8 = vector.shape_cast %7 : vector<1x16x32xbf16> to vector<16x32xbf16>
      %cst_8 = arith.constant dense<0.000000e+00> : vector<8x32xf32>
      %9 = tpu.matmul %6, %8, %cst_8 {dimension_numbers = #tpu.dot_dimension_numbers<[1], [0], [0], [1], [0, 0, 1, 1], [], []>} : vector<8x16xbf16>, vector<16x32xbf16>, vector<8x32xf32> -> vector<8x32xf32>
      %10 = arith.addf %2, %9 : vector<8x32xf32>
      %c0_i32_9 = arith.constant 0 : i32
      %11 = arith.addi %arg5, %c0_i32_9 : i32
      %12 = arith.index_cast %11 : i32 to index
      %c1 = arith.constant 1 : index
      %c0_10 = arith.constant 0 : index
      %13 = vector.load %arg1[%12, %c1, %c0_10] : memref<9x9x16xbf16, #tpu.memory_space<vmem>>, vector<1x8x16xbf16>
      %14 = vector.shape_cast %13 : vector<1x8x16xbf16> to vector<8x16xbf16>
      %c1_11 = arith.constant 1 : index
      %c0_12 = arith.constant 0 : index
      %c0_13 = arith.constant 0 : index
      %15 = vector.load %arg2[%c1_11, %c0_12, %c0_13] : memref<4x16x32xbf16, #tpu.memory_space<vmem>>, vector<1x16x32xbf16>
      %16 = vector.shape_cast %15 : vector<1x16x32xbf16> to vector<16x32xbf16>
      %cst_14 = arith.constant dense<0.000000e+00> : vector<8x32xf32>
      %17 = tpu.matmul %14, %16, %cst_14 {dimension_numbers = #tpu.dot_dimension_numbers<[1], [0], [0], [1], [0, 0, 1, 1], [], []>} : vector<8x16xbf16>, vector<16x32xbf16>, vector<8x32xf32> -> vector<8x32xf32>
      %18 = arith.addf %10, %17 : vector<8x32xf32>
      %c1_i32_15 = arith.constant 1 : i32
      %19 = arith.addi %arg5, %c1_i32_15 : i32
      %20 = arith.index_cast %19 : i32 to index
      %c0_16 = arith.constant 0 : index
      %c0_17 = arith.constant 0 : index
      %21 = vector.load %arg1[%20, %c0_16, %c0_17] : memref<9x9x16xbf16, #tpu.memory_space<vmem>>, vector<1x8x16xbf16>
      %22 = vector.shape_cast %21 : vector<1x8x16xbf16> to vector<8x16xbf16>
      %c2 = arith.constant 2 : index
      %c0_18 = arith.constant 0 : index
      %c0_19 = arith.constant 0 : index
      %23 = vector.load %arg2[%c2, %c0_18, %c0_19] : memref<4x16x32xbf16, #tpu.memory_space<vmem>>, vector<1x16x32xbf16>
      %24 = vector.shape_cast %23 : vector<1x16x32xbf16> to vector<16x32xbf16>
      %cst_20 = arith.constant dense<0.000000e+00> : vector<8x32xf32>
      %25 = tpu.matmul %22, %24, %cst_20 {dimension_numbers = #tpu.dot_dimension_numbers<[1], [0], [0], [1], [0, 0, 1, 1], [], []>} : vector<8x16xbf16>, vector<16x32xbf16>, vector<8x32xf32> -> vector<8x32xf32>
      %26 = arith.addf %18, %25 : vector<8x32xf32>
      %c1_i32_21 = arith.constant 1 : i32
      %27 = arith.addi %arg5, %c1_i32_21 : i32
      %28 = arith.index_cast %27 : i32 to index
      %c1_22 = arith.constant 1 : index
      %c0_23 = arith.constant 0 : index
      %29 = vector.load %arg1[%28, %c1_22, %c0_23] : memref<9x9x16xbf16, #tpu.memory_space<vmem>>, vector<1x8x16xbf16>
      %30 = vector.shape_cast %29 : vector<1x8x16xbf16> to vector<8x16xbf16>
      %c3 = arith.constant 3 : index
      %c0_24 = arith.constant 0 : index
      %c0_25 = arith.constant 0 : index
      %31 = vector.load %arg2[%c3, %c0_24, %c0_25] : memref<4x16x32xbf16, #tpu.memory_space<vmem>>, vector<1x16x32xbf16>
      %32 = vector.shape_cast %31 : vector<1x16x32xbf16> to vector<16x32xbf16>
      %cst_26 = arith.constant dense<0.000000e+00> : vector<8x32xf32>
      %33 = tpu.matmul %30, %32, %cst_26 {dimension_numbers = #tpu.dot_dimension_numbers<[1], [0], [0], [1], [0, 0, 1, 1], [], []>} : vector<8x16xbf16>, vector<16x32xbf16>, vector<8x32xf32> -> vector<8x32xf32>
      %34 = arith.addf %26, %33 : vector<8x32xf32>
      %35 = vector.broadcast %0 : vector<1x32xf32> to vector<8x32xf32>
      %36 = arith.addf %34, %35 : vector<8x32xf32>
      %37 = arith.truncf %36 : vector<8x32xf32> to vector<8x32xbf16>
      %38 = arith.index_cast %arg5 : i32 to index
      %c0_27 = arith.constant 0 : index
      %c0_28 = arith.constant 0 : index
      %39 = vector.load %arg4[%38, %c0_27, %c0_28] : memref<8x8x32xbf16, #tpu.memory_space<vmem>>, vector<1x8x32xbf16>
      %40 = vector.shape_cast %39 : vector<1x8x32xbf16> to vector<8x32xbf16>
      %41 = vector.shape_cast %37 : vector<8x32xbf16> to vector<1x8x32xbf16>
      tpu.vector_store %arg4[%38, %c0_27, %c0_28], %41 {strides = array<i32>} : memref<8x8x32xbf16, #tpu.memory_space<vmem>>, vector<1x8x32xbf16>,
    }
    %c8_i32_1 = arith.constant 8 : i32
    return
  }
  func.func @transform_0(%arg0: i32) -> (i32, i32, i32) {
    %c0_i32 = arith.constant 0 : i32
    %c0_i32_0 = arith.constant 0 : i32
    %c0_i32_1 = arith.constant 0 : i32
    return %arg0, %c0_i32, %c0_i32_0 : i32, i32, i32
  }
  func.func @transform_1(%arg0: i32) -> (i32, i32, i32) {
    %c0_i32 = arith.constant 0 : i32
    %c0_i32_0 = arith.constant 0 : i32
    %c0_i32_1 = arith.constant 0 : i32
    %c0_i32_2 = arith.constant 0 : i32
    return %c0_i32, %c0_i32_0, %c0_i32_1 : i32, i32, i32
  }
  func.func @transform_2(%arg0: i32) -> (i32, i32) {
    %c0_i32 = arith.constant 0 : i32
    %c0_i32_0 = arith.constant 0 : i32
    %c0_i32_1 = arith.constant 0 : i32
    return %c0_i32, %c0_i32_0 : i32, i32
  }
  func.func @transform_3(%arg0: i32) -> (i32, i32, i32) {
    %c0_i32 = arith.constant 0 : i32
    %c0_i32_0 = arith.constant 0 : i32
    %c0_i32_1 = arith.constant 0 : i32
    return %arg0, %c0_i32, %c0_i32_0 : i32, i32, i32
  }
}

module attributes {stable_mosaic.version = 11 : i64} {
  func.func @_conv_s2d_kernel(%arg0: i32, %arg1: memref<5x5x128xbf16, #tpu.memory_space<vmem>>, %arg2: memref<4x128x64xbf16, #tpu.memory_space<vmem>>, %arg3: memref<1x64xf32, #tpu.memory_space<vmem>>, %arg4: memref<4x4x64xbf16, #tpu.memory_space<vmem>>) attributes {dimension_semantics = [#tpu.dimension_semantics<parallel>], iteration_bounds = array<i64: 2>, scalar_prefetch = 0 : i64, scratch_operands = 0 : i64, tpu.core_type = #tpu.core_type<tc>, window_params = [{transform_indices = @transform_0, window_bounds = array<i64: 5, 5, 128>}, {pipeline_mode = #tpu.pipeline_mode<synchronous>, transform_indices = @transform_1, window_bounds = array<i64: 4, 128, 64>}, {pipeline_mode = #tpu.pipeline_mode<synchronous>, transform_indices = @transform_2, window_bounds = array<i64: 1, 64>}, {transform_indices = @transform_3, window_bounds = array<i64: 4, 4, 64>}]} {
    %c0 = arith.constant 0 : index
    %c0_0 = arith.constant 0 : index
    %0 = vector.load %arg3[%c0, %c0_0] : memref<1x64xf32, #tpu.memory_space<vmem>>, vector<1x64xf32>
    %c0_i32 = arith.constant 0 : i32
    %c4_i32 = arith.constant 4 : i32
    %1 = arith.addi %c0_i32, %c4_i32 : i32
    %c1_i32 = arith.constant 1 : i32
    scf.for %arg5 = %c0_i32 to %1 step %c1_i32  : i32 {
      %cst = arith.constant 0.000000e+00 : f32
      %2 = vector.broadcast %cst : f32 to vector<4x64xf32>
      %c0_i32_2 = arith.constant 0 : i32
      %3 = arith.addi %arg5, %c0_i32_2 : i32
      %4 = arith.index_cast %3 : i32 to index
      %c0_3 = arith.constant 0 : index
      %c0_4 = arith.constant 0 : index
      %5 = vector.load %arg1[%4, %c0_3, %c0_4] : memref<5x5x128xbf16, #tpu.memory_space<vmem>>, vector<1x4x128xbf16>
      %6 = vector.shape_cast %5 : vector<1x4x128xbf16> to vector<4x128xbf16>
      %c0_5 = arith.constant 0 : index
      %c0_6 = arith.constant 0 : index
      %c0_7 = arith.constant 0 : index
      %7 = vector.load %arg2[%c0_5, %c0_6, %c0_7] : memref<4x128x64xbf16, #tpu.memory_space<vmem>>, vector<1x128x64xbf16>
      %8 = vector.shape_cast %7 : vector<1x128x64xbf16> to vector<128x64xbf16>
      %cst_8 = arith.constant dense<0.000000e+00> : vector<4x64xf32>
      %9 = tpu.matmul %6, %8, %cst_8 {dimension_numbers = #tpu.dot_dimension_numbers<[1], [0], [0], [1], [0, 0, 1, 1], [], []>} : vector<4x128xbf16>, vector<128x64xbf16>, vector<4x64xf32> -> vector<4x64xf32>
      %10 = arith.addf %2, %9 : vector<4x64xf32>
      %c0_i32_9 = arith.constant 0 : i32
      %11 = arith.addi %arg5, %c0_i32_9 : i32
      %12 = arith.index_cast %11 : i32 to index
      %c1 = arith.constant 1 : index
      %c0_10 = arith.constant 0 : index
      %13 = vector.load %arg1[%12, %c1, %c0_10] : memref<5x5x128xbf16, #tpu.memory_space<vmem>>, vector<1x4x128xbf16>
      %14 = vector.shape_cast %13 : vector<1x4x128xbf16> to vector<4x128xbf16>
      %c1_11 = arith.constant 1 : index
      %c0_12 = arith.constant 0 : index
      %c0_13 = arith.constant 0 : index
      %15 = vector.load %arg2[%c1_11, %c0_12, %c0_13] : memref<4x128x64xbf16, #tpu.memory_space<vmem>>, vector<1x128x64xbf16>
      %16 = vector.shape_cast %15 : vector<1x128x64xbf16> to vector<128x64xbf16>
      %cst_14 = arith.constant dense<0.000000e+00> : vector<4x64xf32>
      %17 = tpu.matmul %14, %16, %cst_14 {dimension_numbers = #tpu.dot_dimension_numbers<[1], [0], [0], [1], [0, 0, 1, 1], [], []>} : vector<4x128xbf16>, vector<128x64xbf16>, vector<4x64xf32> -> vector<4x64xf32>
      %18 = arith.addf %10, %17 : vector<4x64xf32>
      %c1_i32_15 = arith.constant 1 : i32
      %19 = arith.addi %arg5, %c1_i32_15 : i32
      %20 = arith.index_cast %19 : i32 to index
      %c0_16 = arith.constant 0 : index
      %c0_17 = arith.constant 0 : index
      %21 = vector.load %arg1[%20, %c0_16, %c0_17] : memref<5x5x128xbf16, #tpu.memory_space<vmem>>, vector<1x4x128xbf16>
      %22 = vector.shape_cast %21 : vector<1x4x128xbf16> to vector<4x128xbf16>
      %c2 = arith.constant 2 : index
      %c0_18 = arith.constant 0 : index
      %c0_19 = arith.constant 0 : index
      %23 = vector.load %arg2[%c2, %c0_18, %c0_19] : memref<4x128x64xbf16, #tpu.memory_space<vmem>>, vector<1x128x64xbf16>
      %24 = vector.shape_cast %23 : vector<1x128x64xbf16> to vector<128x64xbf16>
      %cst_20 = arith.constant dense<0.000000e+00> : vector<4x64xf32>
      %25 = tpu.matmul %22, %24, %cst_20 {dimension_numbers = #tpu.dot_dimension_numbers<[1], [0], [0], [1], [0, 0, 1, 1], [], []>} : vector<4x128xbf16>, vector<128x64xbf16>, vector<4x64xf32> -> vector<4x64xf32>
      %26 = arith.addf %18, %25 : vector<4x64xf32>
      %c1_i32_21 = arith.constant 1 : i32
      %27 = arith.addi %arg5, %c1_i32_21 : i32
      %28 = arith.index_cast %27 : i32 to index
      %c1_22 = arith.constant 1 : index
      %c0_23 = arith.constant 0 : index
      %29 = vector.load %arg1[%28, %c1_22, %c0_23] : memref<5x5x128xbf16, #tpu.memory_space<vmem>>, vector<1x4x128xbf16>
      %30 = vector.shape_cast %29 : vector<1x4x128xbf16> to vector<4x128xbf16>
      %c3 = arith.constant 3 : index
      %c0_24 = arith.constant 0 : index
      %c0_25 = arith.constant 0 : index
      %31 = vector.load %arg2[%c3, %c0_24, %c0_25] : memref<4x128x64xbf16, #tpu.memory_space<vmem>>, vector<1x128x64xbf16>
      %32 = vector.shape_cast %31 : vector<1x128x64xbf16> to vector<128x64xbf16>
      %cst_26 = arith.constant dense<0.000000e+00> : vector<4x64xf32>
      %33 = tpu.matmul %30, %32, %cst_26 {dimension_numbers = #tpu.dot_dimension_numbers<[1], [0], [0], [1], [0, 0, 1, 1], [], []>} : vector<4x128xbf16>, vector<128x64xbf16>, vector<4x64xf32> -> vector<4x64xf32>
      %34 = arith.addf %26, %33 : vector<4x64xf32>
      %35 = vector.broadcast %0 : vector<1x64xf32> to vector<4x64xf32>
      %36 = arith.addf %34, %35 : vector<4x64xf32>
      %37 = arith.truncf %36 : vector<4x64xf32> to vector<4x64xbf16>
      %38 = arith.index_cast %arg5 : i32 to index
      %c0_27 = arith.constant 0 : index
      %c0_28 = arith.constant 0 : index
      %39 = vector.load %arg4[%38, %c0_27, %c0_28] : memref<4x4x64xbf16, #tpu.memory_space<vmem>>, vector<1x4x64xbf16>
      %40 = vector.shape_cast %39 : vector<1x4x64xbf16> to vector<4x64xbf16>
      %41 = vector.shape_cast %37 : vector<4x64xbf16> to vector<1x4x64xbf16>
      tpu.vector_store %arg4[%38, %c0_27, %c0_28], %41 {strides = array<i32>} : memref<4x4x64xbf16, #tpu.memory_space<vmem>>, vector<1x4x64xbf16>,
    }
    %c4_i32_1 = arith.constant 4 : i32
    return
  }
  func.func @transform_0(%arg0: i32) -> (i32, i32, i32) {
    %c0_i32 = arith.constant 0 : i32
    %c0_i32_0 = arith.constant 0 : i32
    %c0_i32_1 = arith.constant 0 : i32
    return %arg0, %c0_i32, %c0_i32_0 : i32, i32, i32
  }
  func.func @transform_1(%arg0: i32) -> (i32, i32, i32) {
    %c0_i32 = arith.constant 0 : i32
    %c0_i32_0 = arith.constant 0 : i32
    %c0_i32_1 = arith.constant 0 : i32
    %c0_i32_2 = arith.constant 0 : i32
    return %c0_i32, %c0_i32_0, %c0_i32_1 : i32, i32, i32
  }
  func.func @transform_2(%arg0: i32) -> (i32, i32) {
    %c0_i32 = arith.constant 0 : i32
    %c0_i32_0 = arith.constant 0 : i32
    %c0_i32_1 = arith.constant 0 : i32
    return %c0_i32, %c0_i32_0 : i32, i32
  }
  func.func @transform_3(%arg0: i32) -> (i32, i32, i32) {
    %c0_i32 = arith.constant 0 : i32
    %c0_i32_0 = arith.constant 0 : i32
    %c0_i32_1 = arith.constant 0 : i32
    return %arg0, %c0_i32, %c0_i32_0 : i32, i32, i32
  }
}

module attributes {stable_mosaic.version = 11 : i64} {
  func.func @_conv_s2d_kernel(%arg0: i32, %arg1: memref<3x3x256xbf16, #tpu.memory_space<vmem>>, %arg2: memref<4x256x128xbf16, #tpu.memory_space<vmem>>, %arg3: memref<1x128xf32, #tpu.memory_space<vmem>>, %arg4: memref<2x2x128xbf16, #tpu.memory_space<vmem>>) attributes {dimension_semantics = [#tpu.dimension_semantics<parallel>], iteration_bounds = array<i64: 2>, scalar_prefetch = 0 : i64, scratch_operands = 0 : i64, tpu.core_type = #tpu.core_type<tc>, window_params = [{transform_indices = @transform_0, window_bounds = array<i64: 3, 3, 256>}, {pipeline_mode = #tpu.pipeline_mode<synchronous>, transform_indices = @transform_1, window_bounds = array<i64: 4, 256, 128>}, {pipeline_mode = #tpu.pipeline_mode<synchronous>, transform_indices = @transform_2, window_bounds = array<i64: 1, 128>}, {transform_indices = @transform_3, window_bounds = array<i64: 2, 2, 128>}]} {
    %c0 = arith.constant 0 : index
    %c0_0 = arith.constant 0 : index
    %0 = vector.load %arg3[%c0, %c0_0] : memref<1x128xf32, #tpu.memory_space<vmem>>, vector<1x128xf32>
    %c0_i32 = arith.constant 0 : i32
    %c2_i32 = arith.constant 2 : i32
    %1 = arith.addi %c0_i32, %c2_i32 : i32
    %c1_i32 = arith.constant 1 : i32
    scf.for %arg5 = %c0_i32 to %1 step %c1_i32  : i32 {
      %cst = arith.constant 0.000000e+00 : f32
      %2 = vector.broadcast %cst : f32 to vector<2x128xf32>
      %c0_i32_2 = arith.constant 0 : i32
      %3 = arith.addi %arg5, %c0_i32_2 : i32
      %4 = arith.index_cast %3 : i32 to index
      %c0_3 = arith.constant 0 : index
      %c0_4 = arith.constant 0 : index
      %5 = vector.load %arg1[%4, %c0_3, %c0_4] : memref<3x3x256xbf16, #tpu.memory_space<vmem>>, vector<1x2x256xbf16>
      %6 = vector.shape_cast %5 : vector<1x2x256xbf16> to vector<2x256xbf16>
      %c0_5 = arith.constant 0 : index
      %c0_6 = arith.constant 0 : index
      %c0_7 = arith.constant 0 : index
      %7 = vector.load %arg2[%c0_5, %c0_6, %c0_7] : memref<4x256x128xbf16, #tpu.memory_space<vmem>>, vector<1x256x128xbf16>
      %8 = vector.shape_cast %7 : vector<1x256x128xbf16> to vector<256x128xbf16>
      %cst_8 = arith.constant dense<0.000000e+00> : vector<2x128xf32>
      %9 = tpu.matmul %6, %8, %cst_8 {dimension_numbers = #tpu.dot_dimension_numbers<[1], [0], [0], [1], [0, 0, 1, 1], [], []>} : vector<2x256xbf16>, vector<256x128xbf16>, vector<2x128xf32> -> vector<2x128xf32>
      %10 = arith.addf %2, %9 : vector<2x128xf32>
      %c0_i32_9 = arith.constant 0 : i32
      %11 = arith.addi %arg5, %c0_i32_9 : i32
      %12 = arith.index_cast %11 : i32 to index
      %c1 = arith.constant 1 : index
      %c0_10 = arith.constant 0 : index
      %13 = vector.load %arg1[%12, %c1, %c0_10] : memref<3x3x256xbf16, #tpu.memory_space<vmem>>, vector<1x2x256xbf16>
      %14 = vector.shape_cast %13 : vector<1x2x256xbf16> to vector<2x256xbf16>
      %c1_11 = arith.constant 1 : index
      %c0_12 = arith.constant 0 : index
      %c0_13 = arith.constant 0 : index
      %15 = vector.load %arg2[%c1_11, %c0_12, %c0_13] : memref<4x256x128xbf16, #tpu.memory_space<vmem>>, vector<1x256x128xbf16>
      %16 = vector.shape_cast %15 : vector<1x256x128xbf16> to vector<256x128xbf16>
      %cst_14 = arith.constant dense<0.000000e+00> : vector<2x128xf32>
      %17 = tpu.matmul %14, %16, %cst_14 {dimension_numbers = #tpu.dot_dimension_numbers<[1], [0], [0], [1], [0, 0, 1, 1], [], []>} : vector<2x256xbf16>, vector<256x128xbf16>, vector<2x128xf32> -> vector<2x128xf32>
      %18 = arith.addf %10, %17 : vector<2x128xf32>
      %c1_i32_15 = arith.constant 1 : i32
      %19 = arith.addi %arg5, %c1_i32_15 : i32
      %20 = arith.index_cast %19 : i32 to index
      %c0_16 = arith.constant 0 : index
      %c0_17 = arith.constant 0 : index
      %21 = vector.load %arg1[%20, %c0_16, %c0_17] : memref<3x3x256xbf16, #tpu.memory_space<vmem>>, vector<1x2x256xbf16>
      %22 = vector.shape_cast %21 : vector<1x2x256xbf16> to vector<2x256xbf16>
      %c2 = arith.constant 2 : index
      %c0_18 = arith.constant 0 : index
      %c0_19 = arith.constant 0 : index
      %23 = vector.load %arg2[%c2, %c0_18, %c0_19] : memref<4x256x128xbf16, #tpu.memory_space<vmem>>, vector<1x256x128xbf16>
      %24 = vector.shape_cast %23 : vector<1x256x128xbf16> to vector<256x128xbf16>
      %cst_20 = arith.constant dense<0.000000e+00> : vector<2x128xf32>
      %25 = tpu.matmul %22, %24, %cst_20 {dimension_numbers = #tpu.dot_dimension_numbers<[1], [0], [0], [1], [0, 0, 1, 1], [], []>} : vector<2x256xbf16>, vector<256x128xbf16>, vector<2x128xf32> -> vector<2x128xf32>
      %26 = arith.addf %18, %25 : vector<2x128xf32>
      %c1_i32_21 = arith.constant 1 : i32
      %27 = arith.addi %arg5, %c1_i32_21 : i32
      %28 = arith.index_cast %27 : i32 to index
      %c1_22 = arith.constant 1 : index
      %c0_23 = arith.constant 0 : index
      %29 = vector.load %arg1[%28, %c1_22, %c0_23] : memref<3x3x256xbf16, #tpu.memory_space<vmem>>, vector<1x2x256xbf16>
      %30 = vector.shape_cast %29 : vector<1x2x256xbf16> to vector<2x256xbf16>
      %c3 = arith.constant 3 : index
      %c0_24 = arith.constant 0 : index
      %c0_25 = arith.constant 0 : index
      %31 = vector.load %arg2[%c3, %c0_24, %c0_25] : memref<4x256x128xbf16, #tpu.memory_space<vmem>>, vector<1x256x128xbf16>
      %32 = vector.shape_cast %31 : vector<1x256x128xbf16> to vector<256x128xbf16>
      %cst_26 = arith.constant dense<0.000000e+00> : vector<2x128xf32>
      %33 = tpu.matmul %30, %32, %cst_26 {dimension_numbers = #tpu.dot_dimension_numbers<[1], [0], [0], [1], [0, 0, 1, 1], [], []>} : vector<2x256xbf16>, vector<256x128xbf16>, vector<2x128xf32> -> vector<2x128xf32>
      %34 = arith.addf %26, %33 : vector<2x128xf32>
      %35 = vector.broadcast %0 : vector<1x128xf32> to vector<2x128xf32>
      %36 = arith.addf %34, %35 : vector<2x128xf32>
      %37 = arith.truncf %36 : vector<2x128xf32> to vector<2x128xbf16>
      %38 = arith.index_cast %arg5 : i32 to index
      %c0_27 = arith.constant 0 : index
      %c0_28 = arith.constant 0 : index
      %39 = vector.load %arg4[%38, %c0_27, %c0_28] : memref<2x2x128xbf16, #tpu.memory_space<vmem>>, vector<1x2x128xbf16>
      %40 = vector.shape_cast %39 : vector<1x2x128xbf16> to vector<2x128xbf16>
      %41 = vector.shape_cast %37 : vector<2x128xbf16> to vector<1x2x128xbf16>
      tpu.vector_store %arg4[%38, %c0_27, %c0_28], %41 {strides = array<i32>} : memref<2x2x128xbf16, #tpu.memory_space<vmem>>, vector<1x2x128xbf16>,
    }
    %c2_i32_1 = arith.constant 2 : i32
    return
  }
  func.func @transform_0(%arg0: i32) -> (i32, i32, i32) {
    %c0_i32 = arith.constant 0 : i32
    %c0_i32_0 = arith.constant 0 : i32
    %c0_i32_1 = arith.constant 0 : i32
    return %arg0, %c0_i32, %c0_i32_0 : i32, i32, i32
  }
  func.func @transform_1(%arg0: i32) -> (i32, i32, i32) {
    %c0_i32 = arith.constant 0 : i32
    %c0_i32_0 = arith.constant 0 : i32
    %c0_i32_1 = arith.constant 0 : i32
    %c0_i32_2 = arith.constant 0 : i32
    return %c0_i32, %c0_i32_0, %c0_i32_1 : i32, i32, i32
  }
  func.func @transform_2(%arg0: i32) -> (i32, i32) {
    %c0_i32 = arith.constant 0 : i32
    %c0_i32_0 = arith.constant 0 : i32
    %c0_i32_1 = arith.constant 0 : i32
    return %c0_i32, %c0_i32_0 : i32, i32
  }
  func.func @transform_3(%arg0: i32) -> (i32, i32, i32) {
    %c0_i32 = arith.constant 0 : i32
    %c0_i32_0 = arith.constant 0 : i32
    %c0_i32_1 = arith.constant 0 : i32
    return %arg0, %c0_i32, %c0_i32_0 : i32, i32, i32
  }
}

module attributes {stable_mosaic.version = 11 : i64} {
  func.func @_conv_s2d_kernel(%arg0: i32, %arg1: memref<2x2x516xbf16, #tpu.memory_space<vmem>>, %arg2: memref<4x516x32xbf16, #tpu.memory_space<vmem>>, %arg3: memref<1x32xf32, #tpu.memory_space<vmem>>, %arg4: memref<1x1x32xf32, #tpu.memory_space<vmem>>) attributes {dimension_semantics = [#tpu.dimension_semantics<parallel>], iteration_bounds = array<i64: 2>, scalar_prefetch = 0 : i64, scratch_operands = 0 : i64, tpu.core_type = #tpu.core_type<tc>, window_params = [{transform_indices = @transform_0, window_bounds = array<i64: 2, 2, 516>}, {pipeline_mode = #tpu.pipeline_mode<synchronous>, transform_indices = @transform_1, window_bounds = array<i64: 4, 516, 32>}, {pipeline_mode = #tpu.pipeline_mode<synchronous>, transform_indices = @transform_2, window_bounds = array<i64: 1, 32>}, {transform_indices = @transform_3, window_bounds = array<i64: 1, 1, 32>}]} {
    %c0 = arith.constant 0 : index
    %c0_0 = arith.constant 0 : index
    %0 = vector.load %arg3[%c0, %c0_0] : memref<1x32xf32, #tpu.memory_space<vmem>>, vector<1x32xf32>
    %c0_i32 = arith.constant 0 : i32
    %cst = arith.constant 0.000000e+00 : f32
    %1 = vector.broadcast %cst : f32 to vector<1x32xf32>
    %c0_i32_1 = arith.constant 0 : i32
    %2 = arith.addi %c0_i32, %c0_i32_1 : i32
    %3 = arith.index_cast %2 : i32 to index
    %c0_2 = arith.constant 0 : index
    %c0_3 = arith.constant 0 : index
    %4 = vector.load %arg1[%3, %c0_2, %c0_3] : memref<2x2x516xbf16, #tpu.memory_space<vmem>>, vector<1x1x516xbf16>
    %5 = vector.shape_cast %4 : vector<1x1x516xbf16> to vector<1x516xbf16>
    %c0_4 = arith.constant 0 : index
    %c0_5 = arith.constant 0 : index
    %c0_6 = arith.constant 0 : index
    %6 = vector.load %arg2[%c0_4, %c0_5, %c0_6] : memref<4x516x32xbf16, #tpu.memory_space<vmem>>, vector<1x516x32xbf16>
    %7 = vector.shape_cast %6 : vector<1x516x32xbf16> to vector<516x32xbf16>
    %cst_7 = arith.constant dense<0.000000e+00> : vector<1x32xf32>
    %8 = tpu.matmul %5, %7, %cst_7 {dimension_numbers = #tpu.dot_dimension_numbers<[1], [0], [0], [1], [0, 0, 1, 1], [], []>} : vector<1x516xbf16>, vector<516x32xbf16>, vector<1x32xf32> -> vector<1x32xf32>
    %9 = arith.addf %1, %8 : vector<1x32xf32>
    %c0_i32_8 = arith.constant 0 : i32
    %10 = arith.addi %c0_i32, %c0_i32_8 : i32
    %11 = arith.index_cast %10 : i32 to index
    %c1 = arith.constant 1 : index
    %c0_9 = arith.constant 0 : index
    %12 = vector.load %arg1[%11, %c1, %c0_9] : memref<2x2x516xbf16, #tpu.memory_space<vmem>>, vector<1x1x516xbf16>
    %13 = vector.shape_cast %12 : vector<1x1x516xbf16> to vector<1x516xbf16>
    %c1_10 = arith.constant 1 : index
    %c0_11 = arith.constant 0 : index
    %c0_12 = arith.constant 0 : index
    %14 = vector.load %arg2[%c1_10, %c0_11, %c0_12] : memref<4x516x32xbf16, #tpu.memory_space<vmem>>, vector<1x516x32xbf16>
    %15 = vector.shape_cast %14 : vector<1x516x32xbf16> to vector<516x32xbf16>
    %cst_13 = arith.constant dense<0.000000e+00> : vector<1x32xf32>
    %16 = tpu.matmul %13, %15, %cst_13 {dimension_numbers = #tpu.dot_dimension_numbers<[1], [0], [0], [1], [0, 0, 1, 1], [], []>} : vector<1x516xbf16>, vector<516x32xbf16>, vector<1x32xf32> -> vector<1x32xf32>
    %17 = arith.addf %9, %16 : vector<1x32xf32>
    %c1_i32 = arith.constant 1 : i32
    %18 = arith.addi %c0_i32, %c1_i32 : i32
    %19 = arith.index_cast %18 : i32 to index
    %c0_14 = arith.constant 0 : index
    %c0_15 = arith.constant 0 : index
    %20 = vector.load %arg1[%19, %c0_14, %c0_15] : memref<2x2x516xbf16, #tpu.memory_space<vmem>>, vector<1x1x516xbf16>
    %21 = vector.shape_cast %20 : vector<1x1x516xbf16> to vector<1x516xbf16>
    %c2 = arith.constant 2 : index
    %c0_16 = arith.constant 0 : index
    %c0_17 = arith.constant 0 : index
    %22 = vector.load %arg2[%c2, %c0_16, %c0_17] : memref<4x516x32xbf16, #tpu.memory_space<vmem>>, vector<1x516x32xbf16>
    %23 = vector.shape_cast %22 : vector<1x516x32xbf16> to vector<516x32xbf16>
    %cst_18 = arith.constant dense<0.000000e+00> : vector<1x32xf32>
    %24 = tpu.matmul %21, %23, %cst_18 {dimension_numbers = #tpu.dot_dimension_numbers<[1], [0], [0], [1], [0, 0, 1, 1], [], []>} : vector<1x516xbf16>, vector<516x32xbf16>, vector<1x32xf32> -> vector<1x32xf32>
    %25 = arith.addf %17, %24 : vector<1x32xf32>
    %c1_i32_19 = arith.constant 1 : i32
    %26 = arith.addi %c0_i32, %c1_i32_19 : i32
    %27 = arith.index_cast %26 : i32 to index
    %c1_20 = arith.constant 1 : index
    %c0_21 = arith.constant 0 : index
    %28 = vector.load %arg1[%27, %c1_20, %c0_21] : memref<2x2x516xbf16, #tpu.memory_space<vmem>>, vector<1x1x516xbf16>
    %29 = vector.shape_cast %28 : vector<1x1x516xbf16> to vector<1x516xbf16>
    %c3 = arith.constant 3 : index
    %c0_22 = arith.constant 0 : index
    %c0_23 = arith.constant 0 : index
    %30 = vector.load %arg2[%c3, %c0_22, %c0_23] : memref<4x516x32xbf16, #tpu.memory_space<vmem>>, vector<1x516x32xbf16>
    %31 = vector.shape_cast %30 : vector<1x516x32xbf16> to vector<516x32xbf16>
    %cst_24 = arith.constant dense<0.000000e+00> : vector<1x32xf32>
    %32 = tpu.matmul %29, %31, %cst_24 {dimension_numbers = #tpu.dot_dimension_numbers<[1], [0], [0], [1], [0, 0, 1, 1], [], []>} : vector<1x516xbf16>, vector<516x32xbf16>, vector<1x32xf32> -> vector<1x32xf32>
    %33 = arith.addf %25, %32 : vector<1x32xf32>
    %34 = arith.addf %33, %0 : vector<1x32xf32>
    %35 = arith.index_cast %c0_i32 : i32 to index
    %c0_25 = arith.constant 0 : index
    %c0_26 = arith.constant 0 : index
    %36 = vector.load %arg4[%35, %c0_25, %c0_26] : memref<1x1x32xf32, #tpu.memory_space<vmem>>, vector<1x1x32xf32>
    %37 = vector.shape_cast %36 : vector<1x1x32xf32> to vector<1x32xf32>
    %38 = vector.shape_cast %34 : vector<1x32xf32> to vector<1x1x32xf32>
    tpu.vector_store %arg4[%35, %c0_25, %c0_26], %38 {strides = array<i32>} : memref<1x1x32xf32, #tpu.memory_space<vmem>>, vector<1x1x32xf32>,
    %c1_i32_27 = arith.constant 1 : i32
    return
  }
  func.func @transform_0(%arg0: i32) -> (i32, i32, i32) {
    %c0_i32 = arith.constant 0 : i32
    %c0_i32_0 = arith.constant 0 : i32
    %c0_i32_1 = arith.constant 0 : i32
    return %arg0, %c0_i32, %c0_i32_0 : i32, i32, i32
  }
  func.func @transform_1(%arg0: i32) -> (i32, i32, i32) {
    %c0_i32 = arith.constant 0 : i32
    %c0_i32_0 = arith.constant 0 : i32
    %c0_i32_1 = arith.constant 0 : i32
    %c0_i32_2 = arith.constant 0 : i32
    return %c0_i32, %c0_i32_0, %c0_i32_1 : i32, i32, i32
  }
  func.func @transform_2(%arg0: i32) -> (i32, i32) {
    %c0_i32 = arith.constant 0 : i32
    %c0_i32_0 = arith.constant 0 : i32
    %c0_i32_1 = arith.constant 0 : i32
    return %c0_i32, %c0_i32_0 : i32, i32
  }
  func.func @transform_3(%arg0: i32) -> (i32, i32, i32) {
    %c0_i32 = arith.constant 0 : i32
    %c0_i32_0 = arith.constant 0 : i32
    %c0_i32_1 = arith.constant 0 : i32
    return %arg0, %c0_i32, %c0_i32_0 : i32, i32, i32
  }
}

</mosaic_0001>

<bundles_post_ra>
// kernel: conv_patch_embedding.4
= control target key start
LH: loop header
LB: loop body
LE: loop exit
PB: predicated region body
PF: predicated region fallthrough
CT: control target
= control target key end

     0   :  { %s642_s12 = smov 0   ;;  %s701_s0 = inlined_call_operand.vmem [shape: bf16[18,9,16], index: 0, kind: input, shape index: {}]   ;;  %s702_s1 = inlined_call_operand.vmem [shape: bf16[4,16,32], index: 1, kind: input, shape index: {}]   ;;  %s703_s2 = inlined_call_operand.vmem [shape: f32[1,32], index: 2, kind: input, shape index: {}]   ;;  %s704_s3 = inlined_call_operand.vmem [shape: bf16[16,8,32], index: 3, kind: output, shape index: {}]  }
   0x1 LB: > { %s511_s13 = sadd.s32 4294967295, %s614_s12   ;;  %p515_p0 = scmp.ge.s32.totalorder %s614_s12, 1  ;;  %s614_s12 = sphi %s642_s12, %s13_s12  }
   0x2   : > { %p139_p1 = scmp.lt.s32.totalorder %s614_s12, 3 }
   0x4   : > { %p140_p2 = pnand %p515_p0, %p139_p1 }
   0x5   : > { %s164_s14 = smul.u32 (!%p140_p2), 9, %s511_s13  ;;  %s518_s15 = sshll.u32 (!%p140_p2), %s511_s13, 3 }
   0x6   : > { %143 = sbr.rel (%p140_p2) target bundleno = 235 (0xeb), region = 32  ;;  %p172_p3 = scmp.lt.s32.totalorder (!%p140_p2), %s518_s15, 15 }
   0x7   : > { %p165_p4 = scmp.lt.s32.totalorder (!%p140_p2), %s164_s14, 17  ;;  %s665_s26 = smov (!%p140_p2), 0  }
   0xb   : > { %v653_v0 = vld [vmem:[%s703_s2] ss:$0 sm:$0xff]  ;;  %s706_s15 = smov (!%p172_p3, %s518_s15), 15  ;;  %s708_s14 = smov (!%p165_p4, %s164_s14), 17 }
   0xc   : > { %s519_s18 = sshll.u32 %s706_s15, 2  ;;  %s546_s19 = sshll.u32 %s708_s14, 3 }
   0xd   : > { %s658_s22 = scalar_lea.vmem %s704_s3, %s519_s18  ;;  %s663_s25 = scalar_lea.vmem %s701_s0, %s546_s19 }
   0xe LB: >> { %v598_v1 = vld [vmem:[%s702_s1] sm:$0xff]   ;;  %v620_v2 = vmov 0.0   ;;  %v599_v3 = vld [vmem:[%s702_s1 + $0x8] sm:$0xff]   ;;  %vm621_vm0 = vmmov 0   ;;  %s547_s4 = sshll.u32 %s618_s26, 3  ;;  %vm213_vm1 = vcmask 130048   ;;  %s618_s26 = sphi %s665_s26, %s184_s26  }
   0xf   : >> { %562 = vmatprep.subr.bf16.mxu1 %v620_v2  ;;  %556 = vmatprep.subr.bf16.mxu0 %v620_v2  ;;  %s187_s5 = scalar_lea.vmem %s663_s25, %s547_s4  ;;  %v602_v7 = vld [vmem:[%s702_s1 + $0x18] sm:$0xff]   ;;  %v601_v15 = vld [vmem:[%s702_s1 + $0x10] sm:$0xff]   ;;  %s543_s10 = sshll.u32 %s618_s26, 2  ;;  %vm441_vm2 = vcmask 257024  }
  0x10   : >> { %563 = vmatpush3.bf16.msra.mxu1 %v598_v1  ;;  %564 = vmatprep.mubr.msk.bf16.mxu1 %vm621_vm0, %v620_v2  ;;  %v188_v4 = vld [vmem:[%s187_s5] sm:$0xf]  ;;  %v191_v5 = vld [vmem:[%s187_s5 + $0x4] sm:$0x1]  ;;  %v603_v8 = vld [vmem:[%s187_s5 + $0x8] sm:$0x1f]   ;;  %s440_s11 = scalar_lea.vmem %s658_s22, %s543_s10 }
  0x11   : >> { %557 = vmatpush3.bf16.msra.mxu0 %v599_v3  ;;  %558 = vmatprep.mubr.msk.bf16.mxu0 %vm621_vm0, %v620_v2  ;;  %v524_v6 = vcombine.low %v188_v4, %v191_v5  ;;  %v375_v11 = vshrl.u32 %v603_v8, 16  ;;  %v377_v12 = vshll.u32 %v603_v8, 16  ;;  %v530_v18 = vld [vmem:[%s187_s5 + $0x8] sm:$0xf]  ;;  %s184_s26 = sadd.s32 1, %s618_s26  }
  0x12   : >> { %568 = vmatprep.subr.bf16.mxu0 %v620_v2  ;;  %574 = vmatprep.subr.bf16.mxu1 %v620_v2  ;;  %p181_p5 = scmp.ge.s32.totalorder %s184_s26, 8  }
  0x13   : >> { %565 = vmatmul.mubr.msk.bf16.vlgmr.msra.gmra.mxu1 %vm213_vm1, %v188_v4  ;;  %v201_v9 = vshrl.u32 %v524_v6, 16  ;;  %v203_v10 = vshll.u32 %v524_v6, 16  ;;  %v379_v14 = vrot.slane %v377_v12, 1 }
  0x14   : >> { %576 = vmatprep.mubr.msk.bf16.mxu1 %vm621_vm0, %v620_v2  ;;  %575 = vmatpush3.bf16.msra.mxu1 %v602_v7 }
  0x15   : >> { %v205_v13 = vrot.slane %v203_v10, 1  ;;  %v380_v17 = vor.u32 %v379_v14, %v375_v11 }
  0x17   : >> { %v206_v16 = vor.u32 %v205_v13, %v201_v9 }
  0x19   : >> { %559 = vmatmul.mubr.msk.bf16.vlgmr.msra.gmra.mxu0 %vm213_vm1, %v206_v16 }
  0x1a   : >> { %569 = vmatpush3.bf16.msra.mxu0 %v601_v15  ;;  %570 = vmatprep.mubr.msk.bf16.mxu0 %vm621_vm0, %v620_v2 }
  0x1b   : >> { %577 = vmatmul.mubr.msk.bf16.vlgmr.msra.gmra.mxu1 %vm213_vm1, %v380_v17 }
  0x21   : >> { %571 = vmatmul.mubr.msk.bf16.vlgmr.msra.gmra.mxu0 %vm213_vm1, %v530_v18 }
  0xd3   : >> { %v300_v19 = vpop.f32.mrf.mxu1 }
  0xd5   : >> { %v566_v20 = vpop.f32.mrf.mxu1 }
  0xd7   : >> { %v303_v21 = vpop.f32.mrf.mxu1 }
  0xd9   : >> { %v567_v22 = vpop.f32.mrf.mxu1  ;;  %v251_v23 = vpop.f32.mrf.mxu0 }
  0xda   : >> { %v301_v31 = vadd.f32 %v300_v19, %v251_v23 }
  0xdb   : >> { %v424_v24 = vpop.f32.mrf.mxu1  ;;  %v560_v25 = vpop.f32.mrf.mxu0 }
  0xdd   : >> { %v578_v26 = vpop.f32.mrf.mxu1  ;;  %v254_v27 = vpop.f32.mrf.mxu0 }
  0xdf   : >> { %v427_v28 = vpop.f32.mrf.mxu1  ;;  %v561_v29 = vpop.f32.mrf.mxu0 }
  0xe1   : >> { %v579_v30 = vpop.f32.mrf.mxu1  ;;  %v357_v32 = vpop.f32.mrf.mxu0 }
  0xe2   : >> { %v363_v33 = vadd.f32 %v357_v32, %v301_v31 }
  0xe3   : >> { %v572_v34 = vpop.f32.mrf.mxu0 }
  0xe4   : >> { %v430_v35 = vadd.f32 %v424_v24, %v363_v33 }
  0xe5   : >> { %v360_v36 = vpop.f32.mrf.mxu0 }
  0xe6   : >> { %v437_v37 = vadd.f32 %v653_v0, %v430_v35  ;;  %183 = sbr.rel (!%p181_p5) target bundleno = 14 (0xe), region = 75 }
  0xe7   : >> { %v573_v38 = vpop.f32.mrf.mxu0 }
  0xe8   : >> { %v438_v39 = vpack.c.bf16 %v437_v37, %v437_v37 }
  0xea   : >> { %442 = vst.msk [vmem:[%s440_s11] sm:$0xf] %vm441_vm2, %v438_v39 }
  0xeb PF: > { %s13_s12 = sadd.s32 1, %s614_s12  }
  0xec   : > { %p10_p6 = scmp.ge.s32.totalorder %s13_s12, 4  }
  0xee   :  { %12 = sbr.rel (!%p10_p6) target bundleno = 1 (0x1), region = 86 }

// kernel: conv_patch_embedding.5
= control target key start
LH: loop header
LB: loop body
LE: loop exit
PB: predicated region body
PF: predicated region fallthrough
CT: control target
= control target key end

     0   :  { %s1018_s12 = smov 0   ;;  %s1199_s0 = inlined_call_operand.vmem [shape: bf16[10,5,128], index: 0, kind: input, shape index: {}]   ;;  %s1200_s1 = inlined_call_operand.vmem [shape: bf16[4,128,64], index: 1, kind: input, shape index: {}]   ;;  %s1201_s2 = inlined_call_operand.vmem [shape: f32[1,64], index: 2, kind: input, shape index: {}]   ;;  %s1202_s3 = inlined_call_operand.vmem [shape: bf16[8,4,64], index: 3, kind: output, shape index: {}]  }
   0x1 LB: > { %s714_s13 = sadd.s32 4294967295, %s990_s12   ;;  %p718_p0 = scmp.ge.s32.totalorder %s990_s12, 1  ;;  %s990_s12 = sphi %s1018_s12, %s13_s12  }
   0x2   : > { %p138_p1 = scmp.lt.s32.totalorder %s990_s12, 3 }
   0x4   : > { %p139_p2 = pnand %p718_p0, %p138_p1 }
   0x5   : > { %s162_s14 = smul.u32 (!%p139_p2), 5, %s714_s13  ;;  %s720_s15 = sshll.u32 (!%p139_p2), %s714_s13, 2 }
   0x6   : > { %142 = sbr.rel (%p139_p2) target bundleno = 281 (0x119), region = 32  ;;  %p169_p3 = scmp.lt.s32.totalorder (!%p139_p2), %s720_s15, 7 }
   0x7   : > { %p163_p4 = scmp.lt.s32.totalorder (!%p139_p2), %s162_s14, 9  ;;  %s1041_s26 = smov (!%p139_p2), 0  }
   0xb   : > { %v1029_v0 = vld [vmem:[%s1201_s2] ss:$0 sm:$0xff]  ;;  %s1204_s15 = smov (!%p169_p3, %s720_s15), 7  ;;  %s1206_s14 = smov (!%p163_p4, %s162_s14), 9 }
   0xc   : > { %s721_s18 = sshll.u32 %s1204_s15, 1  ;;  %s719_s19 = sshll.u32 %s1206_s14, 2 }
   0xd   : > { %s1034_s22 = scalar_lea.vmem %s1202_s3, %s721_s18  ;;  %s1039_s25 = scalar_lea.vmem %s1199_s0, %s719_s19 }
   0xe LB: >> { %v946_v1 = vld [vmem:[%s1200_s1 + $0x78] sm:$0xff]   ;;  %v996_v2 = vmov 0.0   ;;  %v948_v4 = vld [vmem:[%s1200_s1 + $0x70] sm:$0xff]   ;;  %vm997_vm0 = vmmov 0   ;;  %v950_v6 = vld [vmem:[%s1200_s1 + $0x68] sm:$0xff]   ;;  %s722_s15 = sshll.u32 %s994_s26, 2  ;;  %s994_s26 = sphi %s1041_s26, %s181_s26  }
   0xf   : >> { %848 = vmatprep.subr.bf16.mxu0 %v996_v2  ;;  %868 = vmatprep.subr.bf16.mxu1 %v996_v2  ;;  %v947_v3 = vld [vmem:[%s1200_s1 + $0x38] sm:$0xff]   ;;  %v949_v5 = vld [vmem:[%s1200_s1 + $0x30] sm:$0xff]   ;;  %v951_v7 = vld [vmem:[%s1200_s1 + $0x28] sm:$0xff]   ;;  %s1084_s18 = scalar_lea.vmem %s1039_s25, %s722_s15  ;;  %vm644_vm1 = vcmask 517120  }
  0x10   : >> { %849 = vmatpush3.bf16.msra.mxu0 %v946_v1  ;;  %864 = vmatprep.mubr.msk.bf16.mxu0 %vm997_vm0, %v996_v2  ;;  %v952_v8 = vld [vmem:[%s1200_s1 + $0x60] sm:$0xff]   ;;  %v954_v10 = vld [vmem:[%s1200_s1 + $0x58] sm:$0xff]   ;;  %v956_v13 = vld [vmem:[%s1200_s1 + $0x50] sm:$0xff]  }
  0x11   : >> { %869 = vmatpush3.bf16.msra.mxu1 %v947_v3  ;;  %850 = vmatprep.subr.bf16.mxu0 %v996_v2  ;;  %v953_v9 = vld [vmem:[%s1200_s1 + $0x20] sm:$0xff]   ;;  %v955_v11 = vld [vmem:[%s1200_s1 + $0x18] sm:$0xff]   ;;  %v957_v14 = vld [vmem:[%s1200_s1 + $0x10] sm:$0xff]  }
  0x12   : >> { %870 = vmatprep.subr.bf16.mxu1 %v996_v2  ;;  %884 = vmatprep.mubr.msk.bf16.mxu1 %vm997_vm0, %v996_v2  ;;  %v962_v12 = vld [vmem:[%s1084_s18] ss:$0 sps:$4 sm:$0x77]   ;;  %v958_v16 = vld [vmem:[%s1200_s1 + $0x48] sm:$0xff]   ;;  %v963_v23 = vld [vmem:[%s1200_s1 + $0xb8] sm:$0xff]  }
  0x13   : >> { %v225_v15 = vshll.u32 %v962_v12, 16  ;;  %v959_v17 = vld [vmem:[%s1200_s1 + $0x8] sm:$0xff]   ;;  %v223_v18 = vshrl.u32 %v962_v12, 16  ;;  %v960_v20 = vld [vmem:[%s1200_s1 + $0x40] sm:$0xff]   ;;  %v964_v25 = vld [vmem:[%s1200_s1 + $0xf8] sm:$0xff]  }
  0x14   : >> { %851 = vmatpush3.bf16.msra.mxu0 %v948_v4  ;;  %v961_v21 = vld [vmem:[%s1200_s1] sm:$0xff]   ;;  %v965_v26 = vld [vmem:[%s1200_s1 + $0xb0] sm:$0xff]   ;;  %v967_v28 = vld [vmem:[%s1200_s1 + $0xa8] sm:$0xff]  }
  0x15   : >> { %871 = vmatpush3.bf16.msra.mxu1 %v949_v5  ;;  %852 = vmatprep.subr.bf16.mxu0 %v996_v2  ;;  %v227_v19 = vrot.slane %v225_v15, 1  ;;  %v184_v24 = vld [vmem:[%s1084_s18] sm:$0x3]  ;;  %v966_v27 = vld [vmem:[%s1200_s1 + $0xf0] sm:$0xff]   ;;  %v968_v29 = vld [vmem:[%s1200_s1 + $0xe8] sm:$0xff]  }
  0x16   : >> { %872 = vmatprep.subr.bf16.mxu1 %v996_v2  ;;  %v969_v30 = vld [vmem:[%s1200_s1 + $0xa0] sm:$0xff]   ;;  %v971_v32 = vld [vmem:[%s1200_s1 + $0x98] sm:$0xff]   ;;  %v973_v34 = vld [vmem:[%s1200_s1 + $0x90] sm:$0xff]  }
  0x17   : >> { %v228_v22 = vor.u32 %v227_v19, %v223_v18  ;;  %v970_v31 = vld [vmem:[%s1200_s1 + $0xe0] sm:$0xff]   ;;  %v972_v33 = vld [vmem:[%s1200_s1 + $0xd8] sm:$0xff]   ;;  %v974_v36 = vld [vmem:[%s1200_s1 + $0xd0] sm:$0xff]  }
  0x18   : >> { %853 = vmatpush3.bf16.msra.mxu0 %v950_v6  ;;  %v979_v35 = vld [vmem:[%s1084_s18 + $0x4] ss:$0 sps:$4 sm:$0x77]   ;;  %v975_v37 = vld [vmem:[%s1200_s1 + $0x88] sm:$0xff]  }
  0x19   : >> { %873 = vmatpush3.bf16.msra.mxu1 %v951_v7  ;;  %854 = vmatprep.subr.bf16.mxu0 %v996_v2  ;;  %v540_v38 = vshll.u32 %v979_v35, 16  ;;  %v976_v39 = vld [vmem:[%s1200_s1 + $0xc8] sm:$0xff]   ;;  %v977_v40 = vld [vmem:[%s1200_s1 + $0x80] sm:$0xff]   ;;  %v538_v41 = vshrl.u32 %v979_v35, 16 }
  0x1a   : >> { %874 = vmatprep.subr.bf16.mxu1 %v996_v2  ;;  %v978_v43 = vld [vmem:[%s1200_s1 + $0xc0] sm:$0xff]  }
  0x1b   : >> { %v542_v42 = vrot.slane %v540_v38, 1  ;;  %v757_v44 = vld [vmem:[%s1084_s18 + $0x4] sm:$0x3]  ;;  %s809_s18 = sshll.u32 %s994_s26, 1  ;;  %s181_s26 = sadd.s32 1, %s994_s26  }
  0x1c   : >> { %855 = vmatpush3.bf16.msra.mxu0 %v952_v8  ;;  %s643_s24 = scalar_lea.vmem %s1034_s22, %s809_s18  ;;  %p178_p5 = scmp.ge.s32.totalorder %s181_s26, 4  }
  0x1d   : >> { %875 = vmatpush3.bf16.msra.mxu1 %v953_v9  ;;  %856 = vmatprep.subr.bf16.mxu0 %v996_v2  ;;  %v543_v45 = vor.u32 %v542_v42, %v538_v41 }
  0x1e   : >> { %876 = vmatprep.subr.bf16.mxu1 %v996_v2 }
  0x20   : >> { %857 = vmatpush3.bf16.msra.mxu0 %v954_v10 }
  0x21   : >> { %877 = vmatpush3.bf16.msra.mxu1 %v955_v11  ;;  %858 = vmatprep.subr.bf16.mxu0 %v996_v2 }
  0x22   : >> { %878 = vmatprep.subr.bf16.mxu1 %v996_v2 }
  0x24   : >> { %859 = vmatpush3.bf16.msra.mxu0 %v956_v13 }
  0x25   : >> { %879 = vmatpush3.bf16.msra.mxu1 %v957_v14  ;;  %860 = vmatprep.subr.bf16.mxu0 %v996_v2 }
  0x26   : >> { %880 = vmatprep.subr.bf16.mxu1 %v996_v2 }
  0x28   : >> { %861 = vmatpush3.bf16.msra.mxu0 %v958_v16 }
  0x29   : >> { %881 = vmatpush3.bf16.msra.mxu1 %v959_v17  ;;  %862 = vmatprep.subr.bf16.mxu0 %v996_v2 }
  0x2a   : >> { %882 = vmatprep.subr.bf16.mxu1 %v996_v2 }
  0x2c   : >> { %863 = vmatpush3.bf16.msra.mxu0 %v960_v20 }
  0x2d   : >> { %883 = vmatpush3.bf16.msra.mxu1 %v961_v21  ;;  %888 = vmatprep.subr.bf16.mxu0 %v996_v2 }
  0x2e   : >> { %908 = vmatprep.subr.bf16.mxu1 %v996_v2 }
  0x2f   : >> { %865 = vmatmul.mubr.bf16.vlgmr.msra.gmra.mxu0 %v228_v22 }
  0x30   : >> { %885 = vmatmul.mubr.bf16.vlgmr.msra.gmra.mxu1 %v184_v24  ;;  %889 = vmatpush3.bf16.msra.mxu0 %v963_v23 }
  0x31   : >> { %909 = vmatpush3.bf16.msra.mxu1 %v964_v25  ;;  %890 = vmatprep.subr.bf16.mxu0 %v996_v2 }
  0x32   : >> { %910 = vmatprep.subr.bf16.mxu1 %v996_v2  ;;  %904 = vmatprep.mubr.msk.bf16.mxu0 %vm997_vm0, %v996_v2 }
  0x33   : >> { %924 = vmatprep.mubr.msk.bf16.mxu1 %vm997_vm0, %v996_v2 }
  0x34   : >> { %891 = vmatpush3.bf16.msra.mxu0 %v965_v26 }
  0x35   : >> { %911 = vmatpush3.bf16.msra.mxu1 %v966_v27  ;;  %892 = vmatprep.subr.bf16.mxu0 %v996_v2 }
  0x36   : >> { %912 = vmatprep.subr.bf16.mxu1 %v996_v2 }
  0x38   : >> { %893 = vmatpush3.bf16.msra.mxu0 %v967_v28 }
  0x39   : >> { %913 = vmatpush3.bf16.msra.mxu1 %v968_v29  ;;  %894 = vmatprep.subr.bf16.mxu0 %v996_v2 }
  0x3a   : >> { %914 = vmatprep.subr.bf16.mxu1 %v996_v2 }
  0x3c   : >> { %895 = vmatpush3.bf16.msra.mxu0 %v969_v30 }
  0x3d   : >> { %915 = vmatpush3.bf16.msra.mxu1 %v970_v31  ;;  %896 = vmatprep.subr.bf16.mxu0 %v996_v2 }
  0x3e   : >> { %916 = vmatprep.subr.bf16.mxu1 %v996_v2 }
  0x40   : >> { %897 = vmatpush3.bf16.msra.mxu0 %v971_v32 }
  0x41   : >> { %917 = vmatpush3.bf16.msra.mxu1 %v972_v33  ;;  %898 = vmatprep.subr.bf16.mxu0 %v996_v2 }
  0x42   : >> { %918 = vmatprep.subr.bf16.mxu1 %v996_v2 }
  0x44   : >> { %899 = vmatpush3.bf16.msra.mxu0 %v973_v34 }
  0x45   : >> { %919 = vmatpush3.bf16.msra.mxu1 %v974_v36  ;;  %900 = vmatprep.subr.bf16.mxu0 %v996_v2 }
  0x46   : >> { %920 = vmatprep.subr.bf16.mxu1 %v996_v2 }
  0x48   : >> { %901 = vmatpush3.bf16.msra.mxu0 %v975_v37 }
  0x49   : >> { %921 = vmatpush3.bf16.msra.mxu1 %v976_v39  ;;  %902 = vmatprep.subr.bf16.mxu0 %v996_v2 }
  0x4a   : >> { %922 = vmatprep.subr.bf16.mxu1 %v996_v2 }
  0x4c   : >> { %903 = vmatpush3.bf16.msra.mxu0 %v977_v40 }
  0x4d   : >> { %923 = vmatpush3.bf16.msra.mxu1 %v978_v43 }
  0x4f   : >> { %905 = vmatmul.mubr.bf16.vlgmr.msra.gmra.mxu0 %v757_v44 }
  0x50   : >> { %925 = vmatmul.mubr.bf16.vlgmr.msra.gmra.mxu1 %v543_v45 }
  0xef   : >> { %v312_v46 = vpop.f32.mrf.mxu0 }
  0xf0   : >> { %v400_v47 = vpop.f32.mrf.mxu1 }
  0xf1   : >> { %v866_v48 = vpop.f32.mrf.mxu0  ;;  %v401_v54 = vadd.f32 %v400_v47, %v312_v46 }
  0xf2   : >> { %v886_v49 = vpop.f32.mrf.mxu1 }
  0xf3   : >> { %v315_v50 = vpop.f32.mrf.mxu0 }
  0xf4   : >> { %v403_v51 = vpop.f32.mrf.mxu1 }
  0xf5   : >> { %v867_v52 = vpop.f32.mrf.mxu0 }
  0xf6   : >> { %v887_v53 = vpop.f32.mrf.mxu1 }
 0x10f   : >> { %v509_v55 = vpop.f32.mrf.mxu0 }
 0x110   : >> { %v515_v56 = vadd.f32 %v509_v55, %v401_v54  ;;  %v627_v57 = vpop.f32.mrf.mxu1 }
 0x111   : >> { %v906_v58 = vpop.f32.mrf.mxu0 }
 0x112   : >> { %v633_v59 = vadd.f32 %v627_v57, %v515_v56  ;;  %v926_v60 = vpop.f32.mrf.mxu1 }
 0x113   : >> { %v512_v61 = vpop.f32.mrf.mxu0 }
 0x114   : >> { %v640_v62 = vadd.f32 %v1029_v0, %v633_v59  ;;  %v630_v63 = vpop.f32.mrf.mxu1  ;;  %180 = sbr.rel (!%p178_p5) target bundleno = 14 (0xe), region = 75 }
 0x115   : >> { %v907_v1 = vpop.f32.mrf.mxu0 }
 0x116   : >> { %v641_v2 = vpack.c.bf16 %v640_v62, %v640_v62  ;;  %v927_v3 = vpop.f32.mrf.mxu1 }
 0x118   : >> { %645 = vst.msk [vmem:[%s643_s24] sm:$0x3] %vm644_vm1, %v641_v2 }
 0x119 PF: > { %s13_s12 = sadd.s32 1, %s990_s12  }
 0x11a   : > { %p10_p6 = scmp.ge.s32.totalorder %s13_s12, 4  }
 0x11c   :  { %12 = sbr.rel (!%p10_p6) target bundleno = 1 (0x1), region = 86 }

// kernel: conv_patch_embedding.6
= control target key start
LH: loop header
LB: loop body
LE: loop exit
PB: predicated region body
PF: predicated region fallthrough
CT: control target
= control target key end

     0   :  { %s1400_s12 = smov 0   ;;  %s1642_s0 = inlined_call_operand.vmem [shape: bf16[6,3,256], index: 0, kind: input, shape index: {}]   ;;  %s1643_s1 = inlined_call_operand.vmem [shape: bf16[4,256,128], index: 1, kind: input, shape index: {}]   ;;  %s1644_s2 = inlined_call_operand.vmem [shape: f32[1,128], index: 2, kind: input, shape index: {}]   ;;  %s1645_s3 = inlined_call_operand.vmem [shape: bf16[4,2,128], index: 3, kind: output, shape index: {}]  }
   0x1 LB: > { %s1014_s13 = sadd.s32 4294967295, %s1374_s12   ;;  %p1018_p0 = scmp.ge.s32.totalorder %s1374_s12, 1  ;;  %s1374_s12 = sphi %s1400_s12, %s13_s12  }
   0x2   : > { %p139_p1 = scmp.lt.s32.totalorder %s1374_s12, 3 }
   0x4   : > { %p140_p2 = pnand %p1018_p0, %p139_p1 }
   0x5   : > { %s163_s14 = smul.u32 (!%p140_p2), 3, %s1014_s13  ;;  %s1021_s15 = sshll.u32 (!%p140_p2), %s1014_s13, 1 }
   0x6   : > { %143 = sbr.rel (%p140_p2) target bundleno = 286 (0x11e), region = 32  ;;  %p171_p3 = scmp.lt.s32.totalorder (!%p140_p2), %s1021_s15, 3 }
   0x7   : > { %p164_p4 = scmp.lt.s32.totalorder (!%p140_p2), %s163_s14, 5  ;;  %s1424_s25 = smov (!%p140_p2), 0  }
   0xb   : > { %v1411_v0 = vld [vmem:[%s1644_s2] ss:$0 sm:$0xff]  ;;  %s1647_s15 = smov (!%p171_p3, %s1021_s15), 3  ;;  %s1649_s14 = smov (!%p164_p4, %s163_s14), 5 }
   0xc   : > { %s173_s20 = scalar_lea.vmem %s1645_s3, %s1647_s15  ;;  %s1194_s21 = sshll.u32 %s1649_s14, 2 }
   0xd   : > { %s1422_s24 = scalar_lea.vmem %s1642_s0, %s1194_s21 }
   0xe LB: >> { %v1300_v1 = vld [vmem:[%s1643_s1 + $0xf8] sm:$0xff]   ;;  %v1304_v5 = vld [vmem:[%s1643_s1 + $0xf0] sm:$0xff]   ;;  %v1308_v9 = vld [vmem:[%s1643_s1 + $0xe8] sm:$0xff]   ;;  %s1195_s9 = sshll.u32 %s1378_s25, 2  ;;  %s951_s28 = scalar_lea.vmem %s173_s20, %s1378_s25  ;;  %s1378_s25 = sphi %s1424_s25, %s182_s25  }
   0xf   : >> { %v1301_v2 = vld [vmem:[%s1643_s1 + $0x78] sm:$0xff]   ;;  %1196 = vmatprep.subr.bf16.mxu0 %v1300_v1  ;;  %v1305_v6 = vld [vmem:[%s1643_s1 + $0x70] sm:$0xff]   ;;  %v1309_v10 = vld [vmem:[%s1643_s1 + $0x68] sm:$0xff]   ;;  %s1521_s18 = scalar_lea.vmem %s1422_s24, %s1195_s9  ;;  %s182_s25 = sadd.s32 1, %s1378_s25  }
  0x10   : >> { %v1302_v3 = vld [vmem:[%s1643_s1 + $0xb8] sm:$0xff]   ;;  %1218 = vmatprep.subr.bf16.mxu1 %v1301_v2  ;;  %v1306_v7 = vld [vmem:[%s1643_s1 + $0xb0] sm:$0xff]   ;;  %v1310_v11 = vld [vmem:[%s1643_s1 + $0xa8] sm:$0xff]   ;;  %p179_p5 = scmp.ge.s32.totalorder %s182_s25, 2  }
  0x11   : >> { %v1303_v4 = vld [vmem:[%s1643_s1 + $0x38] sm:$0xff]   ;;  %1197 = vmatpush3.bf16.msra.mxu0 %v1302_v3  ;;  %v1307_v8 = vld [vmem:[%s1643_s1 + $0x30] sm:$0xff]   ;;  %v1311_v12 = vld [vmem:[%s1643_s1 + $0x28] sm:$0xff]  }
  0x12   : >> { %1219 = vmatpush3.bf16.msra.mxu1 %v1303_v4  ;;  %1198 = vmatprep.subr.bf16.mxu0 %v1304_v5  ;;  %v1312_v13 = vld [vmem:[%s1643_s1 + $0xe0] sm:$0xff]   ;;  %v1316_v17 = vld [vmem:[%s1643_s1 + $0xd8] sm:$0xff]   ;;  %v1320_v21 = vld [vmem:[%s1643_s1 + $0xd0] sm:$0xff]  }
  0x13   : >> { %1220 = vmatprep.subr.bf16.mxu1 %v1305_v6  ;;  %v1313_v14 = vld [vmem:[%s1643_s1 + $0x60] sm:$0xff]   ;;  %v1317_v18 = vld [vmem:[%s1643_s1 + $0x58] sm:$0xff]   ;;  %v1321_v22 = vld [vmem:[%s1643_s1 + $0x50] sm:$0xff]  }
  0x14   : >> { %v1314_v15 = vld [vmem:[%s1643_s1 + $0xa0] sm:$0xff]   ;;  %v1318_v19 = vld [vmem:[%s1643_s1 + $0x98] sm:$0xff]   ;;  %v1322_v23 = vld [vmem:[%s1643_s1 + $0x90] sm:$0xff]  }
  0x15   : >> { %1199 = vmatpush3.bf16.msra.mxu0 %v1306_v7  ;;  %v1315_v16 = vld [vmem:[%s1643_s1 + $0x20] sm:$0xff]   ;;  %v1319_v20 = vld [vmem:[%s1643_s1 + $0x18] sm:$0xff]   ;;  %v1323_v24 = vld [vmem:[%s1643_s1 + $0x10] sm:$0xff]  }
  0x16   : >> { %1221 = vmatpush3.bf16.msra.mxu1 %v1307_v8  ;;  %1200 = vmatprep.subr.bf16.mxu0 %v1308_v9  ;;  %v1324_v25 = vld [vmem:[%s1643_s1 + $0xc8] sm:$0xff]   ;;  %v1328_v29 = vld [vmem:[%s1643_s1 + $0xc0] sm:$0xff]   ;;  %v1332_v39 = vld [vmem:[%s1643_s1 + $0x178] sm:$0xff]  }
  0x17   : >> { %1222 = vmatprep.subr.bf16.mxu1 %v1309_v10  ;;  %v1325_v26 = vld [vmem:[%s1643_s1 + $0x48] sm:$0xff]   ;;  %v1329_v30 = vld [vmem:[%s1643_s1 + $0x40] sm:$0xff]   ;;  %v1333_v43 = vld [vmem:[%s1643_s1 + $0x1f8] sm:$0xff]  }
  0x18   : >> { %v1326_v27 = vld [vmem:[%s1643_s1 + $0x88] sm:$0xff]   ;;  %v1330_v31 = vld [vmem:[%s1643_s1 + $0x80] sm:$0xff]   ;;  %v1335_v45 = vld [vmem:[%s1643_s1 + $0x1b8] sm:$0xff]  }
  0x19   : >> { %1201 = vmatpush3.bf16.msra.mxu0 %v1310_v11  ;;  %v1327_v28 = vld [vmem:[%s1643_s1 + $0x8] sm:$0xff]   ;;  %v1331_v32 = vld [vmem:[%s1643_s1] sm:$0xff]   ;;  %v1334_v47 = vld [vmem:[%s1643_s1 + $0x138] sm:$0xff]  }
  0x1a   : >> { %1223 = vmatpush3.bf16.msra.mxu1 %v1311_v12  ;;  %1202 = vmatprep.subr.bf16.mxu0 %v1312_v13  ;;  %v1056_v33 = vld.sshfl [vmem:[%s1521_s18] sm:$0x33 pattern:$0x76325410]  ;;  %v1337_v49 = vld [vmem:[%s1643_s1 + $0x1f0] sm:$0xff]   ;;  %v1341_v53 = vld [vmem:[%s1643_s1 + $0x1e8] sm:$0xff]  }
  0x1b   : >> { %1224 = vmatprep.subr.bf16.mxu1 %v1313_v14  ;;  %v261_v34 = vcombine.high %v1056_v33, %v1056_v33  ;;  %v1073_v35 = vld.sshfl [vmem:[%s1521_s18] sm:$0x11 pattern:$0x76325410]  ;;  %v265_v36 = vshll.u32 %v1056_v33, 16  ;;  %v263_v38 = vshrl.u32 %v1056_v33, 16 }
  0x1c   : >> { %v422_v37 = vcombine.high %v1073_v35, %v1073_v35  ;;  %v1336_v50 = vld [vmem:[%s1643_s1 + $0x170] sm:$0xff]   ;;  %v1340_v54 = vld [vmem:[%s1643_s1 + $0x168] sm:$0xff]   ;;  %v1345_v57 = vld [vmem:[%s1643_s1 + $0x1e0] sm:$0xff]  }
  0x1d   : >> { %1203 = vmatpush3.bf16.msra.mxu0 %v1314_v15  ;;  %v270_v40 = vshrl.u32 %v261_v34, 16  ;;  %v272_v41 = vshll.u32 %v261_v34, 16  ;;  %v267_v42 = vrot.slane %v265_v36, 1  ;;  %v1339_v51 = vld [vmem:[%s1643_s1 + $0x1b0] sm:$0xff]   ;;  %v1343_v55 = vld [vmem:[%s1643_s1 + $0x1a8] sm:$0xff]   ;;  %v1344_v58 = vld [vmem:[%s1643_s1 + $0x160] sm:$0xff]  }
  0x1e   : >> { %1225 = vmatpush3.bf16.msra.mxu1 %v1315_v16  ;;  %1204 = vmatprep.subr.bf16.mxu0 %v1316_v17  ;;  %v1338_v52 = vld [vmem:[%s1643_s1 + $0x130] sm:$0xff]   ;;  %v1342_v56 = vld [vmem:[%s1643_s1 + $0x128] sm:$0xff]   ;;  %v1347_v59 = vld [vmem:[%s1643_s1 + $0x1a0] sm:$0xff]  }
  0x1f   : >> { %1226 = vmatprep.subr.bf16.mxu1 %v1317_v18  ;;  %553 = vmatprep.mubr.bf16.mxu1 %v422_v37  ;;  %v274_v44 = vrot.slane %v272_v41, 1  ;;  %v268_v46 = vor.u32 %v267_v42, %v263_v38  ;;  %v1346_v60 = vld [vmem:[%s1643_s1 + $0x120] sm:$0xff]   ;;  %v1349_v61 = vld [vmem:[%s1643_s1 + $0x1d8] sm:$0xff]   ;;  %v1353_v2 = vld [vmem:[%s1643_s1 + $0x1d0] sm:$0xff]  }
  0x20   : >> { %v1348_v62 = vld [vmem:[%s1643_s1 + $0x158] sm:$0xff]   ;;  %v1352_v3 = vld [vmem:[%s1643_s1 + $0x150] sm:$0xff]   ;;  %v1357_v6 = vld [vmem:[%s1643_s1 + $0x1c8] sm:$0xff]  }
  0x21   : >> { %1205 = vmatpush3.bf16.msra.mxu0 %v1318_v19  ;;  %v275_v48 = vor.u32 %v274_v44, %v270_v40  ;;  %v1351_v63 = vld [vmem:[%s1643_s1 + $0x198] sm:$0xff]   ;;  %v1355_v4 = vld [vmem:[%s1643_s1 + $0x190] sm:$0xff]   ;;  %v1356_v7 = vld [vmem:[%s1643_s1 + $0x148] sm:$0xff]  }
  0x22   : >> { %1227 = vmatpush3.bf16.msra.mxu1 %v1319_v20  ;;  %1206 = vmatprep.subr.bf16.mxu0 %v1320_v21  ;;  %v1350_v1 = vld [vmem:[%s1643_s1 + $0x118] sm:$0xff]   ;;  %v1354_v5 = vld [vmem:[%s1643_s1 + $0x110] sm:$0xff]   ;;  %v1359_v8 = vld [vmem:[%s1643_s1 + $0x188] sm:$0xff]  }
  0x23   : >> { %1228 = vmatprep.subr.bf16.mxu1 %v1321_v22  ;;  %406 = vmatprep.mubr.bf16.mxu0 %v275_v48  ;;  %v1358_v9 = vld [vmem:[%s1643_s1 + $0x108] sm:$0xff]   ;;  %v1361_v10 = vld [vmem:[%s1643_s1 + $0x1c0] sm:$0xff]  }
  0x24   : >> { %v1360_v11 = vld [vmem:[%s1643_s1 + $0x140] sm:$0xff]  }
  0x25   : >> { %1207 = vmatpush3.bf16.msra.mxu0 %v1322_v23  ;;  %v1363_v12 = vld [vmem:[%s1643_s1 + $0x180] sm:$0xff]  }
  0x26   : >> { %1229 = vmatpush3.bf16.msra.mxu1 %v1323_v24  ;;  %1208 = vmatprep.subr.bf16.mxu0 %v1324_v25  ;;  %v1124_v13 = vld.sshfl [vmem:[%s1521_s18 + $0x4] sm:$0x11 pattern:$0x76325410] }
  0x27   : >> { %1230 = vmatprep.subr.bf16.mxu1 %v1325_v26  ;;  %v1362_v14 = vld [vmem:[%s1643_s1 + $0x100] sm:$0xff]   ;;  %v607_v15 = vcombine.high %v1124_v13, %v1124_v13 }
  0x28   : >> { %v1174_v16 = vld.sshfl [vmem:[%s1521_s18 + $0x4] sm:$0x33 pattern:$0x76325410] }
  0x29   : >> { %1209 = vmatpush3.bf16.msra.mxu0 %v1326_v27  ;;  %v789_v17 = vcombine.high %v1174_v16, %v1174_v16  ;;  %v793_v18 = vshll.u32 %v1174_v16, 16  ;;  %v791_v19 = vshrl.u32 %v1174_v16, 16 }
  0x2a   : >> { %1231 = vmatpush3.bf16.msra.mxu1 %v1327_v28  ;;  %1210 = vmatprep.subr.bf16.mxu0 %v1328_v29 }
  0x2b   : >> { %1232 = vmatprep.subr.bf16.mxu1 %v1329_v30  ;;  %v798_v20 = vshrl.u32 %v789_v17, 16  ;;  %v800_v21 = vshll.u32 %v789_v17, 16  ;;  %v795_v22 = vrot.slane %v793_v18, 1 }
  0x2d   : >> { %1211 = vmatpush3.bf16.msra.mxu0 %v1330_v31  ;;  %v802_v23 = vrot.slane %v800_v21, 1  ;;  %v796_v24 = vor.u32 %v795_v22, %v791_v19 }
  0x2e   : >> { %1233 = vmatpush3.bf16.msra.mxu1 %v1331_v32  ;;  %1240 = vmatprep.subr.bf16.mxu0 %v1332_v39 }
  0x2f   : >> { %1262 = vmatprep.subr.bf16.mxu1 %v1333_v43  ;;  %v803_v25 = vor.u32 %v802_v23, %v798_v20 }
  0x30   : >> { %407 = vmatmul.mubr.bf16.vlgmr.msra.gmra.mxu0 %v268_v46 }
  0x31   : >> { %554 = vmatmul.mubr.bf16.vlgmr.msra.gmra.mxu1 %v1073_v35  ;;  %1241 = vmatpush3.bf16.msra.mxu0 %v1334_v47 }
  0x32   : >> { %1263 = vmatpush3.bf16.msra.mxu1 %v1335_v45  ;;  %1242 = vmatprep.subr.bf16.mxu0 %v1336_v50 }
  0x33   : >> { %1264 = vmatprep.subr.bf16.mxu1 %v1337_v49  ;;  %738 = vmatprep.mubr.bf16.mxu0 %v607_v15 }
  0x34   : >> { %934 = vmatprep.mubr.bf16.mxu1 %v803_v25 }
  0x35   : >> { %1243 = vmatpush3.bf16.msra.mxu0 %v1338_v52 }
  0x36   : >> { %1265 = vmatpush3.bf16.msra.mxu1 %v1339_v51  ;;  %1244 = vmatprep.subr.bf16.mxu0 %v1340_v54 }
  0x37   : >> { %1266 = vmatprep.subr.bf16.mxu1 %v1341_v53 }
  0x39   : >> { %1245 = vmatpush3.bf16.msra.mxu0 %v1342_v56 }
  0x3a   : >> { %1267 = vmatpush3.bf16.msra.mxu1 %v1343_v55  ;;  %1246 = vmatprep.subr.bf16.mxu0 %v1344_v58 }
  0x3b   : >> { %1268 = vmatprep.subr.bf16.mxu1 %v1345_v57 }
  0x3d   : >> { %1247 = vmatpush3.bf16.msra.mxu0 %v1346_v60 }
  0x3e   : >> { %1269 = vmatpush3.bf16.msra.mxu1 %v1347_v59  ;;  %1248 = vmatprep.subr.bf16.mxu0 %v1348_v62 }
  0x3f   : >> { %1270 = vmatprep.subr.bf16.mxu1 %v1349_v61 }
  0x41   : >> { %1249 = vmatpush3.bf16.msra.mxu0 %v1350_v1 }
  0x42   : >> { %1271 = vmatpush3.bf16.msra.mxu1 %v1351_v63  ;;  %1250 = vmatprep.subr.bf16.mxu0 %v1352_v3 }
  0x43   : >> { %1272 = vmatprep.subr.bf16.mxu1 %v1353_v2 }
  0x45   : >> { %1251 = vmatpush3.bf16.msra.mxu0 %v1354_v5 }
  0x46   : >> { %1273 = vmatpush3.bf16.msra.mxu1 %v1355_v4  ;;  %1252 = vmatprep.subr.bf16.mxu0 %v1356_v7 }
  0x47   : >> { %1274 = vmatprep.subr.bf16.mxu1 %v1357_v6 }
  0x49   : >> { %1253 = vmatpush3.bf16.msra.mxu0 %v1358_v9 }
  0x4a   : >> { %1275 = vmatpush3.bf16.msra.mxu1 %v1359_v8  ;;  %1254 = vmatprep.subr.bf16.mxu0 %v1360_v11 }
  0x4b   : >> { %1276 = vmatprep.subr.bf16.mxu1 %v1361_v10 }
  0x4d   : >> { %1255 = vmatpush3.bf16.msra.mxu0 %v1362_v14 }
  0x4e   : >> { %1277 = vmatpush3.bf16.msra.mxu1 %v1363_v12 }
  0x50   : >> { %739 = vmatmul.mubr.bf16.vlgmr.msra.gmra.mxu0 %v1124_v13 }
  0x51   : >> { %935 = vmatmul.mubr.bf16.vlgmr.msra.gmra.mxu1 %v796_v24 }
  0xf0   : >> { %v1212_v29 = vpop.f32.mrf.mxu0 }
  0xf1   : >> { %v1234_v26 = vpop.f32.mrf.mxu1 }
  0xf2   : >> { %v1213_v31 = vpop.f32.mrf.mxu0 }
  0xf3   : >> { %v1235_v27 = vpop.f32.mrf.mxu1  ;;  %v1214_v34 = vadd.f32 %v1213_v31, %v1212_v29 }
  0xf4   : >> { %v1215_v32 = vpop.f32.mrf.mxu0  ;;  %v1236_v35 = vadd.f32 %v1235_v27, %v1234_v26 }
  0xf5   : >> { %v1237_v28 = vpop.f32.mrf.mxu1 }
  0xf6   : >> { %v1216_v33 = vpop.f32.mrf.mxu0  ;;  %v556_v38 = vadd.f32 %v1236_v35, %v1214_v34 }
  0xf7   : >> { %v1238_v30 = vpop.f32.mrf.mxu1 }
 0x110   : >> { %v1256_v36 = vpop.f32.mrf.mxu0 }
 0x111   : >> { %v1278_v39 = vpop.f32.mrf.mxu1 }
 0x112   : >> { %v1257_v37 = vpop.f32.mrf.mxu0 }
 0x113   : >> { %v1258_v40 = vadd.f32 %v1257_v37, %v1256_v36  ;;  %v1279_v43 = vpop.f32.mrf.mxu1 }
 0x114   : >> { %v1259_v41 = vpop.f32.mrf.mxu0  ;;  %v1280_v44 = vadd.f32 %v1279_v43, %v1278_v39 }
 0x115   : >> { %v746_v42 = vadd.f32 %v1258_v40, %v556_v38  ;;  %v1281_v46 = vpop.f32.mrf.mxu1 }
 0x116   : >> { %v1260_v45 = vpop.f32.mrf.mxu0 }
 0x117   : >> { %v942_v47 = vadd.f32 %v1280_v44, %v746_v42  ;;  %v1282_v48 = vpop.f32.mrf.mxu1 }
 0x119   : >> { %v949_v49 = vadd.f32 %v1411_v0, %v942_v47  ;;  %181 = sbr.rel (!%p179_p5) target bundleno = 14 (0xe), region = 75 }
 0x11b   : >> { %v950_v50 = vpack.c.bf16 %v949_v49, %v949_v49 }
 0x11d   : >> { %952 = vst [vmem:[%s951_s28] sm:$0x1] %v950_v50 }
 0x11e PF: > { %s13_s12 = sadd.s32 1, %s1374_s12  }
 0x11f   : > { %p10_p6 = scmp.ge.s32.totalorder %s13_s12, 4  }
 0x121   :  { %12 = sbr.rel (!%p10_p6) target bundleno = 1 (0x1), region = 86 }

// kernel: conv_patch_embedding.7
= control target key start
LH: loop header
LB: loop body
LE: loop exit
PB: predicated region body
PF: predicated region fallthrough
CT: control target
= control target key end

     0   :  { %8 = vsyncpa [#allocation3], 0  ;;  %s3317_s0 = inlined_call_operand.vmem [shape: bf16[4,2,516], index: 0, kind: input, shape index: {}]   ;;  %s3318_s1 = inlined_call_operand.vmem [shape: bf16[4,516,32], index: 1, kind: input, shape index: {}]   ;;  %s3319_s2 = inlined_call_operand.vmem [shape: f32[1,32], index: 2, kind: input, shape index: {}]   ;;  %s3320_s3 = inlined_call_operand.hbm [shape: f32[2,1,32], index: 3, kind: output, shape index: {}]  }
   0x1   :  { %10 = vsyncpa [#allocation3 + $0x1], 0  ;;  %s2776_s12 = smov 0   ;;  %s2778_s13 = smov 0  }
   0x2   :  { %s2780_s14 = smov 0   ;;  %s2782_s15 = smov 0  }
   0x3 LB: > { %s2797_s16 = sadd.s32 4294967295, %s2750_s15   ;;  %s1963_s17 = sadd.s32 4294967294, %s2750_s15   ;;  %s2750_s15 = sphi %s2782_s15, %s3326_s15   ;;  %s2746_s14 = sphi %s2780_s14, %s3325_s14   ;;  %s2742_s13 = sphi %s2778_s13, %s3324_s13   ;;  %s2738_s12 = sphi %s2776_s12, %s3323_s12  }
   0x4   : > { %s2801_s18 = sadd.s32 1, %s2750_s15   ;;  %s91_s19 = sadd.s32 1, %s2746_s14 }
   0x5   : > { %s88_s20 = ssub.s32 %s2750_s15, %s2801_s18  ;;  %p101_p0 = scmp.ne.s32.totalorder %s2746_s14, %s2742_s13 }
   0x6   : > { %p89_p1 = scmp.eq.s32.totalorder %s88_s20, 0  ;;  %p102_p2 = scmp.eq.s32.totalorder %s2797_s16, 1 }
   0x7   : > { %p107_p3 = scmp.ne.s32.totalorder %s2742_s13, %s2738_s12  ;;  %p108_p4 = scmp.eq.s32.totalorder %s1963_s17, 1 }
   0x8   : > { %s2812_s21 = scalar_select %p89_p1, %s2746_s14, %s91_s19  }
   0x9   : > { %p2814_p5 = por %p102_p2, %p101_p0  ;;  %p2818_p6 = por %p108_p4, %p107_p3 }
   0xa   : > { %p1966_p7 = scmp.ge.s32.totalorder %s2750_s15, 1  ;;  %p141_p8 = scmp.lt.s32.totalorder %s2750_s15, 3 }
   0xc   : > { %p142_p9 = pnand %p1966_p7, %p141_p8 }
   0xd   : > { %s1967_s26 = sshll.u32 (!%p142_p9), %s2797_s16, 1  ;;  %s2301_s8 = sshll.u32 (!%p142_p9), %s2797_s16, 4 }
   0xe   : > { %145 = sbr.rel (%p142_p9) target bundleno = 383 (0x17f), region = 32  ;;  %p165_p10 = scmp.lt.s32.totalorder (!%p142_p9), %s1967_s26, 3 }
   0xf   : > { %s1906_s19 = scalar_lea.hbm (!%p142_p9), %s3320_s3, %s2301_s8  ;;  %s2755_s25 = smov (!%p142_p9), [#allocation2]  }
  0x13   : > { %v2555_v0 = vld [vmem:[%s3318_s1 + $0x17c] sm:$0xff]   ;;  %v2559_v4 = vld [vmem:[%s3318_s1 + $0x174] sm:$0xff]   ;;  %v2563_v8 = vld [vmem:[%s3318_s1 + $0x16c] sm:$0xff]   ;;  %s3328_s26 = smov (!%p165_p10, %s1967_s26), 3  ;;  %v309_v30 = vlaneseq  ;;  %v2752_v33 = vmov 1966171168  }
  0x14   : > { %v2556_v1 = vld [vmem:[%s3318_s1 + $0x1fc] sm:$0xff]   ;;  %2304 = vmatprep.subr.bf16.mxu0 %v2555_v0  ;;  %v2560_v5 = vld [vmem:[%s3318_s1 + $0x1f4] sm:$0xff]   ;;  %v2564_v9 = vld [vmem:[%s3318_s1 + $0x1ec] sm:$0xff]   ;;  %s2512_s5 = smul.u32 5, %s3328_s26  ;;  %v307_v34 = vunpack.c.l.s4 %v2752_v33  ;;  %v2753_v36 = vmov 0.0   ;;  %vm562_vm0 = vcmask 1041408  }
  0x15   : > { %v2557_v2 = vld [vmem:[%s3318_s1 + $0x13c] sm:$0xff]   ;;  %2326 = vmatprep.subr.bf16.mxu1 %v2556_v1  ;;  %v2561_v6 = vld [vmem:[%s3318_s1 + $0x134] sm:$0xff]   ;;  %v2565_v10 = vld [vmem:[%s3318_s1 + $0x12c] sm:$0xff]   ;;  %v310_v35 = vshrl.u32 %v309_v30, 7  ;;  %vm2754_vm1 = vmmov 0   ;;  %vm558_vm2 = vcmask 31744  }
  0x16   : > { %v2558_v3 = vld [vmem:[%s3318_s1 + $0x1bc] sm:$0xff]   ;;  %2305 = vmatpush3.bf16.msra.mxu0 %v2557_v2  ;;  %v2562_v7 = vld [vmem:[%s3318_s1 + $0x1b4] sm:$0xff]   ;;  %v2566_v11 = vld [vmem:[%s3318_s1 + $0x1ac] sm:$0xff]   ;;  %s2924_s17 = scalar_lea.vmem %s3317_s0, %s2512_s5  ;;  %v308_v38 = vunpack.c.0.s8 %v307_v34  ;;  %s162_s5 = sand.u32 1, %s2742_s13   ;;  %vm1893_vm3 = vcmask 253952  }
  0x17   : > { %2327 = vmatpush3.bf16.msra.mxu1 %v2558_v3  ;;  %2306 = vmatprep.subr.bf16.mxu0 %v2559_v4  ;;  %v2567_v12 = vld [vmem:[%s3318_s1 + $0x164] sm:$0xff]   ;;  %v2571_v16 = vld [vmem:[%s3318_s1 + $0x15c] sm:$0xff]   ;;  %v2575_v20 = vld [vmem:[%s3318_s1 + $0x154] sm:$0xff]   ;;  %s163_s9 = scalar_lea.vmem [#allocation2], %s162_s5  ;;  %s1896_s20 = scalar_lea.sflag [#allocation3], %s162_s5 }
  0x18   : > { %2328 = vmatprep.subr.bf16.mxu1 %v2560_v5  ;;  %v2568_v13 = vld [vmem:[%s3318_s1 + $0x1e4] sm:$0xff]   ;;  %v2572_v17 = vld [vmem:[%s3318_s1 + $0x1dc] sm:$0xff]   ;;  %v2576_v21 = vld [vmem:[%s3318_s1 + $0x1d4] sm:$0xff]   ;;  %v2931_v40 = vsub.s32 %v308_v38, %v310_v35  ;;  %s1908_s10 = sshll.u32 %s163_s9, 4  ;;  %s1909_s10 = int_to_ptr.vmem [resolvable:$true] %s1908_s10 }
  0x19   : > { %v2569_v14 = vld [vmem:[%s3318_s1 + $0x124] sm:$0xff]   ;;  %v2573_v18 = vld [vmem:[%s3318_s1 + $0x11c] sm:$0xff]   ;;  %v2577_v22 = vld [vmem:[%s3318_s1 + $0x114] sm:$0xff]   ;;  %s2690_s24 = scalar_lea.vmem %s1909_s10, 16 }
  0x1a   : > { %2307 = vmatpush3.bf16.msra.mxu0 %v2561_v6  ;;  %v2570_v15 = vld [vmem:[%s3318_s1 + $0x1a4] sm:$0xff]   ;;  %v2574_v19 = vld [vmem:[%s3318_s1 + $0x19c] sm:$0xff]   ;;  %v2578_v23 = vld [vmem:[%s3318_s1 + $0x194] sm:$0xff]   ;;  %p2691_p11 = scmp.ne.s32.totalorder %s1909_s10, %s2690_s24 }
  0x1b   : > { %2329 = vmatpush3.bf16.msra.mxu1 %v2562_v7  ;;  %2308 = vmatprep.subr.bf16.mxu0 %v2563_v8  ;;  %v2579_v24 = vld [vmem:[%s3318_s1 + $0x14c] sm:$0xff]   ;;  %v2583_v28 = vld [vmem:[%s3318_s1 + $0x144] sm:$0xff]   ;;  %v2588_v37 = vld [vmem:[%s3318_s1 + $0x78] sm:$0xff]  }
  0x1c   : > { %2330 = vmatprep.subr.bf16.mxu1 %v2564_v9  ;;  %v2580_v25 = vld [vmem:[%s3318_s1 + $0x1cc] sm:$0xff]   ;;  %v2584_v29 = vld [vmem:[%s3318_s1 + $0x1c4] sm:$0xff]   ;;  %v2590_v54 = vld [vmem:[%s3318_s1 + $0x38] sm:$0xff]   ;;  %p2692_p12 = pnand %p2691_p11, %p2814_p5 }
  0x1d   : > { %v2581_v26 = vld [vmem:[%s3318_s1 + $0x10c] sm:$0xff]   ;;  %v2585_v31 = vld [vmem:[%s3318_s1 + $0x104] sm:$0xff]   ;;  %v2593_v56 = vld [vmem:[%s3318_s1 + $0xf8] sm:$0xff]  }
  0x1e   : > { %2309 = vmatpush3.bf16.msra.mxu0 %v2565_v10  ;;  %v2582_v27 = vld [vmem:[%s3318_s1 + $0x18c] sm:$0xff]   ;;  %v2586_v32 = vld [vmem:[%s3318_s1 + $0x184] sm:$0xff]   ;;  %v2595_v62 = vld [vmem:[%s3318_s1 + $0xb8] sm:$0xff]   ;;  %p2693_p13 = pneg %p2692_p12 }
  0x1f   : > { %2331 = vmatpush3.bf16.msra.mxu1 %v2566_v11  ;;  %2310 = vmatprep.subr.bf16.mxu0 %v2567_v12  ;;  %v172_v39 = vld [vmem:[%s2924_s17] sm:$0x1f]  ;;  %v2591_v57 = vld [vmem:[%s3318_s1 + $0x70] sm:$0xff]   ;;  %v2594_v61 = vld [vmem:[%s3318_s1 + $0x68] sm:$0xff]  }
  0x20   : > { %2332 = vmatprep.subr.bf16.mxu1 %v2568_v13  ;;  %v312_v41 = vrot.slane %v172_v39, %v2931_v40  ;;  %v2589_v42 = vld [vmem:[%s3318_s1 + $0x204] ss:$0 sps:$4 sm:$0x33]   ;;  %v305_v43 = vcombine.high %v172_v39, %v172_v39  ;;  %v2592_v59 = vld [vmem:[%s3318_s1 + $0x30] sm:$0xff]   ;;  %v2596_v0 = vld [vmem:[%s3318_s1 + $0x28] sm:$0xff]  }
  0x21   : > { %v564_v53 = vsel %vm562_vm0, %v2589_v42, 0  ;;  %v2597_v63 = vld [vmem:[%s3318_s1 + $0xf0] sm:$0xff]   ;;  %v2598_v1 = vld [vmem:[%s3318_s1 + $0x60] sm:$0xff]   ;;  %v2601_v3 = vld [vmem:[%s3318_s1 + $0xe8] sm:$0xff]  }
  0x22   : > { %2311 = vmatpush3.bf16.msra.mxu0 %v2569_v14  ;;  %v320_v44 = vcombine.high %v312_v41, %v312_v41  ;;  %v2938_v45 = vrot.slane %v312_v41, %v2931_v40  ;;  %v319_v49 = vrot.slane %v305_v43, %v2931_v40  ;;  %v2599_v2 = vld [vmem:[%s3318_s1 + $0xb0] sm:$0xff]   ;;  %v2600_v4 = vld [vmem:[%s3318_s1 + $0x20] sm:$0xff]   ;;  %v2602_v5 = vld [vmem:[%s3318_s1 + $0x58] sm:$0xff]  }
  0x23   : > { %2333 = vmatpush3.bf16.msra.mxu1 %v2570_v15  ;;  %2312 = vmatprep.subr.bf16.mxu0 %v2571_v16  ;;  %v2603_v6 = vld [vmem:[%s3318_s1 + $0xa8] sm:$0xff]   ;;  %v2605_v7 = vld [vmem:[%s3318_s1 + $0xe0] sm:$0xff]   ;;  %v2604_v8 = vld [vmem:[%s3318_s1 + $0x18] sm:$0xff]  }
  0x24   : > { %2334 = vmatprep.subr.bf16.mxu1 %v2572_v17  ;;  %v341_v46 = vrot.slane %v320_v44, %v2931_v40  ;;  %v345_v47 = vshrl.u32 %v2938_v45, 16  ;;  %v2944_v48 = vcombine.high %v2938_v45, %v2938_v45  ;;  %v2959_v58 = vrot.slane %v319_v49, %v2931_v40  ;;  %v2606_v9 = vld [vmem:[%s3318_s1 + $0x50] sm:$0xff]   ;;  %v2607_v10 = vld [vmem:[%s3318_s1 + $0xa0] sm:$0xff]   ;;  %v2609_v11 = vld [vmem:[%s3318_s1 + $0xd8] sm:$0xff]  }
  0x25   : > { %v2608_v12 = vld [vmem:[%s3318_s1 + $0x10] sm:$0xff]   ;;  %v2610_v13 = vld [vmem:[%s3318_s1 + $0x48] sm:$0xff]   ;;  %v2611_v14 = vld [vmem:[%s3318_s1 + $0x98] sm:$0xff]  }
  0x26   : > { %2313 = vmatpush3.bf16.msra.mxu0 %v2573_v18  ;;  %v348_v50 = vshrl.u32 %v341_v46, 16  ;;  %v343_v51 = vcombine.high %v341_v46, %v341_v46  ;;  %v351_v52 = vshrl.u32 %v2944_v48, 16  ;;  %v357_v60 = vshrl.u32 %v2959_v58, 16  ;;  %v2613_v15 = vld [vmem:[%s3318_s1 + $0xd0] sm:$0xff]   ;;  %v2612_v16 = vld [vmem:[%s3318_s1 + $0x8] sm:$0xff]   ;;  %v2614_v17 = vld [vmem:[%s3318_s1 + $0x40] sm:$0xff]  }
  0x27   : > { %2335 = vmatpush3.bf16.msra.mxu1 %v2574_v19  ;;  %2314 = vmatprep.subr.bf16.mxu0 %v2575_v20  ;;  %v2615_v18 = vld [vmem:[%s3318_s1 + $0x90] sm:$0xff]   ;;  %v2617_v19 = vld [vmem:[%s3318_s1 + $0xc8] sm:$0xff]   ;;  %v2621_v20 = vld [vmem:[%s3318_s1 + $0x100] ss:$0 sps:$4 sm:$0x33]  }
  0x28   : > { %2336 = vmatprep.subr.bf16.mxu1 %v2576_v21  ;;  %598 = vmatprep.mubr.bf16.mxu0 %v348_v50  ;;  %v354_v55 = vshrl.u32 %v343_v51, 16  ;;  %v2616_v21 = vld [vmem:[%s3318_s1] sm:$0xff]   ;;  %v2626_v30 = vld [vmem:[%s3318_s1 + $0x278] sm:$0xff]   ;;  %v2630_v34 = vld [vmem:[%s3318_s1 + $0x270] sm:$0xff]  }
  0x29   : > { %v2629_v33 = vld [vmem:[%s3318_s1 + $0x2b8] sm:$0xff]   ;;  %v2631_v35 = vld [vmem:[%s3318_s1 + $0x2f0] sm:$0xff]   ;;  %v2634_v39 = vld [vmem:[%s3318_s1 + $0x268] sm:$0xff]  }
  0x2a   : > { %2315 = vmatpush3.bf16.msra.mxu0 %v2577_v22  ;;  %638 = vmatprep.mubr.bf16.mxu1 %v354_v55  ;;  %v2618_v22 = vld [vmem:[%s3318_s1 + $0x88] sm:$0xff]   ;;  %v2633_v38 = vld [vmem:[%s3318_s1 + $0x2b0] sm:$0xff]   ;;  %v2638_v43 = vld [vmem:[%s3318_s1 + $0x260] sm:$0xff]  }
  0x2b   : > { %2337 = vmatpush3.bf16.msra.mxu1 %v2578_v23  ;;  %2316 = vmatprep.subr.bf16.mxu0 %v2579_v24  ;;  %v2619_v23 = vld [vmem:[%s3318_s1 + $0xc0] sm:$0xff]   ;;  %v888_v24 = vsel %vm562_vm0, %v2621_v20, 0  ;;  %v2635_v41 = vld [vmem:[%s3318_s1 + $0x2e8] sm:$0xff]   ;;  %v2642_v50 = vld [vmem:[%s3318_s1 + $0x258] sm:$0xff]  }
  0x2c   : > { %2338 = vmatprep.subr.bf16.mxu1 %v2580_v25  ;;  %v2623_v25 = vld [vmem:[%s3318_s1 + $0x300] sm:$0xff]   ;;  %v2636_v42 = vld [vmem:[%s3318_s1 + $0x228] sm:$0xff]  }
  0x2d   : > { %v2101_v44 = vld [vmem:[%s2924_s17 + $0x5] sm:$0x1f]  ;;  %v2666_v20 = vld [vmem:[%s3318_s1 + $0x3bc] sm:$0xff]  }
  0x2e   : > { %2317 = vmatpush3.bf16.msra.mxu0 %v2581_v26  ;;  %v2620_v26 = vld [vmem:[%s3318_s1 + $0x80] sm:$0xff]  }
  0x2f   : > { %2339 = vmatpush3.bf16.msra.mxu1 %v2582_v27  ;;  %2318 = vmatprep.subr.bf16.mxu0 %v2583_v28  ;;  %v2622_v27 = vld [vmem:[%s3318_s1 + $0x280] sm:$0xff]  }
  0x30   : > { %2340 = vmatprep.subr.bf16.mxu1 %v2584_v29  ;;  %v2624_v28 = vld [vmem:[%s3318_s1 + $0x240] sm:$0xff]  }
  0x31   : > { %v2625_v29 = vld [vmem:[%s3318_s1 + $0x2c0] sm:$0xff]  }
  0x32   : > { %2319 = vmatpush3.bf16.msra.mxu0 %v2585_v31  ;;  %v2627_v31 = vld [vmem:[%s3318_s1 + $0x2f8] sm:$0xff]  }
  0x33   : > { %2341 = vmatpush3.bf16.msra.mxu1 %v2586_v32  ;;  %2488 = vmatprep.subr.bf16.mxu0 %v2753_v36  ;;  %v2628_v32 = vld [vmem:[%s3318_s1 + $0x238] sm:$0xff]  }
  0x34   : > { %2350 = vmatprep.subr.bf16.mxu1 %v2588_v37  ;;  %v2632_v37 = vld [vmem:[%s3318_s1 + $0x230] sm:$0xff]  }
  0x35   : > { %599 = vmatmul.mubr.bf16.vlgmr.msra.gmra.mxu0 %v345_v47  ;;  %v2639_v47 = vld [vmem:[%s3318_s1 + $0x2e0] sm:$0xff]  }
  0x36   : > { %2489 = vmatpush3.bf16.msra.mxu0 %v564_v53  ;;  %639 = vmatmul.mubr.bf16.vlgmr.msra.gmra.mxu1 %v351_v52  ;;  %v2643_v53 = vld [vmem:[%s3318_s1 + $0x2d8] sm:$0xff]  }
  0x37   : > { %2490 = vmatprep.mubr.msk.bf16.mxu0 %vm2754_vm1, %v2753_v36  ;;  %2351 = vmatpush3.bf16.msra.mxu1 %v2590_v54  ;;  %v2644_v54 = vld [vmem:[%s3318_s1 + $0x218] sm:$0xff]  }
  0x38   : > { %2372 = vmatprep.subr.bf16.mxu0 %v2593_v56  ;;  %2352 = vmatprep.subr.bf16.mxu1 %v2591_v57  ;;  %v2646_v56 = vld [vmem:[%s3318_s1 + $0x250] sm:$0xff]   ;;  %v2645_v57 = vld [vmem:[%s3318_s1 + $0x298] sm:$0xff]  }
  0x39   : > { %922 = vmatprep.mubr.bf16.mxu1 %v341_v46  ;;  %v1086_v46 = vrot.slane %v2101_v44, %v2931_v40 }
  0x3b   : > { %2353 = vmatpush3.bf16.msra.mxu1 %v2592_v59  ;;  %v1094_v49 = vcombine.high %v1086_v46, %v1086_v46  ;;  %v2648_v59 = vld [vmem:[%s3318_s1 + $0x210] sm:$0xff]  }
  0x3c   : > { %2354 = vmatprep.subr.bf16.mxu1 %v2594_v61  ;;  %v2649_v61 = vld [vmem:[%s3318_s1 + $0x290] sm:$0xff]  }
  0x3d   : > { %2491 = vmatmul.mubr.msk.bf16.vlgmr.msra.gmra.mxu0 %vm558_vm2, %v357_v60  ;;  %v1115_v52 = vrot.slane %v1094_v49, %v2931_v40  ;;  %v2650_v60 = vld [vmem:[%s3318_s1 + $0x248] sm:$0xff]   ;;  %v2686_v49 = vld [vmem:[%s3318_s1 + $0x394] sm:$0xff]  }
  0x3e   : > { %2373 = vmatpush3.bf16.msra.mxu0 %v2595_v62  ;;  %962 = vmatprep.mubr.bf16.mxu0 %v343_v51  ;;  %v2641_v51 = vld [vmem:[%s3318_s1 + $0x2a0] sm:$0xff]   ;;  %v2651_v62 = vld [vmem:[%s3318_s1 + $0x2c8] sm:$0xff]  }
  0x3f   : > { %2374 = vmatprep.subr.bf16.mxu0 %v2597_v63  ;;  %2355 = vmatpush3.bf16.msra.mxu1 %v2596_v0  ;;  %v1117_v55 = vcombine.high %v1115_v52, %v1115_v52  ;;  %v2656_v63 = vld [vmem:[%s3318_s1 + $0x308] ss:$0 sps:$4 sm:$0x33]  }
  0x40   : > { %2356 = vmatprep.subr.bf16.mxu1 %v2598_v1  ;;  %v2652_v0 = vld [vmem:[%s3318_s1 + $0x208] sm:$0xff]   ;;  %v1101_v1 = vrot.slane %v1086_v46, %v2931_v40 }
  0x42   : > { %2375 = vmatpush3.bf16.msra.mxu0 %v2599_v2  ;;  %v2653_v2 = vld [vmem:[%s3318_s1 + $0x288] sm:$0xff]  }
  0x43   : > { %2376 = vmatprep.subr.bf16.mxu0 %v2601_v3  ;;  %2357 = vmatpush3.bf16.msra.mxu1 %v2600_v4  ;;  %v1079_v3 = vcombine.high %v2101_v44, %v2101_v44  ;;  %v2655_v4 = vld [vmem:[%s3318_s1 + $0x384] sm:$0xff]  }
  0x44   : > { %2358 = vmatprep.subr.bf16.mxu1 %v2602_v5  ;;  %v1116_v5 = vcombine.high %v1101_v1, %v1101_v1 }
  0x46   : > { %2377 = vmatpush3.bf16.msra.mxu0 %v2603_v6  ;;  %v1321_v6 = vsel %vm562_vm0, %v2656_v63, 0 }
  0x47   : > { %2378 = vmatprep.subr.bf16.mxu0 %v2605_v7  ;;  %2359 = vmatpush3.bf16.msra.mxu1 %v2604_v8  ;;  %v2660_v7 = vld [vmem:[%s3318_s1 + $0x404] sm:$0xff]  }
  0x48   : > { %2360 = vmatprep.subr.bf16.mxu1 %v2606_v9  ;;  %v2657_v8 = vld [vmem:[%s3318_s1 + $0x344] sm:$0xff]   ;;  %v1093_v9 = vrot.slane %v1079_v3, %v2931_v40 }
  0x4a   : > { %2379 = vmatpush3.bf16.msra.mxu0 %v2607_v10  ;;  %v2658_v10 = vld [vmem:[%s3318_s1 + $0x37c] sm:$0xff]  }
  0x4b   : > { %2380 = vmatprep.subr.bf16.mxu0 %v2609_v11  ;;  %2361 = vmatpush3.bf16.msra.mxu1 %v2608_v12  ;;  %v2659_v11 = vld [vmem:[%s3318_s1 + $0x33c] sm:$0xff]   ;;  %v2661_v12 = vld [vmem:[%s3318_s1 + $0x374] sm:$0xff]  }
  0x4c   : > { %2362 = vmatprep.subr.bf16.mxu1 %v2610_v13  ;;  %v1108_v13 = vrot.slane %v1093_v9, %v2931_v40 }
  0x4e   : > { %2381 = vmatpush3.bf16.msra.mxu0 %v2611_v14  ;;  %v2662_v14 = vld [vmem:[%s3318_s1 + $0x3c4] sm:$0xff]  }
  0x4f   : > { %2382 = vmatprep.subr.bf16.mxu0 %v2613_v15  ;;  %2363 = vmatpush3.bf16.msra.mxu1 %v2612_v16  ;;  %v2663_v15 = vld [vmem:[%s3318_s1 + $0x334] sm:$0xff]   ;;  %v2664_v16 = vld [vmem:[%s3318_s1 + $0x3fc] sm:$0xff]  }
  0x50   : > { %2364 = vmatprep.subr.bf16.mxu1 %v2614_v17  ;;  %v2201_v17 = vld [vmem:[%s2924_s17 + $0x5] sm:$0x1f]  ;;  %s2694_s17 = sshll.u32 %s2755_s25, 4  ;;  %s2695_s17 = int_to_ptr.vmem [resolvable:$false] %s2694_s17 }
  0x51   : > { %v1512_v44 = vcombine.high %v2201_v17, %v2201_v17  ;;  %s2696_s16 = scalar_lea.vmem %s2695_s17, 32  ;;  %p2697_p0 = scmp.lt.s32.totalorder %s1909_s10, %s2695_s17 }
  0x52   : > { %2383 = vmatpush3.bf16.msra.mxu0 %v2615_v18  ;;  %v2665_v18 = vld [vmem:[%s3318_s1 + $0x36c] sm:$0xff]   ;;  %p2698_p1 = scmp.lt.s32.totalorder %s2696_s16, %s2690_s24 }
  0x53   : > { %2384 = vmatprep.subr.bf16.mxu0 %v2617_v19  ;;  %2365 = vmatpush3.bf16.msra.mxu1 %v2616_v21  ;;  %v1519_v19 = vrot.slane %v2201_v17, %v2931_v40  ;;  %v2668_v21 = vld [vmem:[%s3318_s1 + $0x3f4] sm:$0xff]  }
  0x54   : > { %2494 = vmatprep.subr.bf16.mxu1 %v2753_v36  ;;  %p2699_p2 = por %p2698_p1, %p2697_p0 }
  0x55   : > { %v1534_v46 = vrot.slane %v1519_v19, %v2931_v40 }
  0x56   : > { %2385 = vmatpush3.bf16.msra.mxu0 %v2618_v22  ;;  %923 = vmatmul.mubr.bf16.vlgmr.msra.gmra.mxu1 %v2938_v45  ;;  %v2637_v45 = vld [vmem:[%s3318_s1 + $0x2a8] sm:$0xff]   ;;  %v1527_v22 = vcombine.high %v1519_v19, %v1519_v19  ;;  %p2700_p3 = pnand %p2699_p2, %p2693_p13 }
  0x57   : > { %2386 = vmatprep.subr.bf16.mxu0 %v2619_v23  ;;  %2495 = vmatpush3.bf16.msra.mxu1 %v888_v24  ;;  %v2667_v23 = vld [vmem:[%s3318_s1 + $0x32c] sm:$0xff]   ;;  %v2669_v24 = vld [vmem:[%s3318_s1 + $0x364] sm:$0xff]  }
  0x58   : > { %2496 = vmatprep.mubr.msk.bf16.mxu1 %vm2754_vm1, %v2753_v36  ;;  %2418 = vmatprep.subr.bf16.mxu1 %v2623_v25  ;;  %v1548_v25 = vrot.slane %v1527_v22, %v2931_v40 }
  0x5a   : > { %2387 = vmatpush3.bf16.msra.mxu0 %v2620_v26  ;;  %v2670_v26 = vld [vmem:[%s3318_s1 + $0x3b4] sm:$0xff]  }
  0x5b   : > { %2396 = vmatprep.subr.bf16.mxu0 %v2622_v27  ;;  %v2672_v27 = vld [vmem:[%s3318_s1 + $0x3ec] sm:$0xff]  }
  0x5d   : > { %963 = vmatmul.mubr.bf16.vlgmr.msra.gmra.mxu0 %v2944_v48  ;;  %v2640_v48 = vld [vmem:[%s3318_s1 + $0x220] sm:$0xff]  }
  0x5e   : > { %2397 = vmatpush3.bf16.msra.mxu0 %v2624_v28  ;;  %2497 = vmatmul.mubr.msk.bf16.vlgmr.msra.gmra.mxu1 %vm558_vm2, %v2959_v58  ;;  %v2647_v58 = vld [vmem:[%s3318_s1 + $0x2d0] sm:$0xff]   ;;  %v1555_v28 = vshrl.u32 %v1548_v25, 16 }
  0x5f   : > { %2398 = vmatprep.subr.bf16.mxu0 %v2626_v30  ;;  %2419 = vmatpush3.bf16.msra.mxu1 %v2625_v29  ;;  %v1550_v29 = vcombine.high %v1548_v25, %v1548_v25  ;;  %v2671_v30 = vld [vmem:[%s3318_s1 + $0x324] sm:$0xff]  }
  0x60   : > { %2420 = vmatprep.subr.bf16.mxu1 %v2627_v31  ;;  %1355 = vmatprep.mubr.bf16.mxu0 %v1115_v52  ;;  %v2673_v31 = vld [vmem:[%s3318_s1 + $0x35c] sm:$0xff]   ;;  %v2687_v52 = vld [vmem:[%s3318_s1 + $0x3cc] sm:$0xff]  }
  0x61   : > { %1395 = vmatprep.mubr.bf16.mxu1 %v1117_v55  ;;  %v2688_v55 = vld [vmem:[%s3318_s1 + $0x38c] sm:$0xff]  }
  0x62   : > { %2399 = vmatpush3.bf16.msra.mxu0 %v2628_v32  ;;  %v1561_v32 = vshrl.u32 %v1550_v29, 16 }
  0x63   : > { %2400 = vmatprep.subr.bf16.mxu0 %v2630_v34  ;;  %2421 = vmatpush3.bf16.msra.mxu1 %v2629_v33  ;;  %v2674_v33 = vld [vmem:[%s3318_s1 + $0x3ac] sm:$0xff]   ;;  %v2676_v34 = vld [vmem:[%s3318_s1 + $0x3e4] sm:$0xff]  }
  0x64   : > { %2422 = vmatprep.subr.bf16.mxu1 %v2631_v35  ;;  %v2675_v35 = vld [vmem:[%s3318_s1 + $0x31c] sm:$0xff]  }
  0x66   : > { %2401 = vmatpush3.bf16.msra.mxu0 %v2632_v37  ;;  %v2677_v37 = vld [vmem:[%s3318_s1 + $0x354] sm:$0xff]  }
  0x67   : > { %2402 = vmatprep.subr.bf16.mxu0 %v2634_v39  ;;  %2423 = vmatpush3.bf16.msra.mxu1 %v2633_v38  ;;  %v2678_v38 = vld [vmem:[%s3318_s1 + $0x3a4] sm:$0xff]   ;;  %v2680_v39 = vld [vmem:[%s3318_s1 + $0x3dc] sm:$0xff]  }
  0x68   : > { %2424 = vmatprep.subr.bf16.mxu1 %v2635_v41  ;;  %v2679_v41 = vld [vmem:[%s3318_s1 + $0x314] sm:$0xff]  }
  0x6a   : > { %2403 = vmatpush3.bf16.msra.mxu0 %v2636_v42  ;;  %v2681_v42 = vld [vmem:[%s3318_s1 + $0x34c] sm:$0xff]  }
  0x6b   : > { %2404 = vmatprep.subr.bf16.mxu0 %v2638_v43  ;;  %2425 = vmatpush3.bf16.msra.mxu1 %v2637_v45  ;;  %v2682_v43 = vld [vmem:[%s3318_s1 + $0x39c] sm:$0xff]   ;;  %v2685_v45 = vld [vmem:[%s3318_s1 + $0x3d4] sm:$0xff]  }
  0x6c   : > { %2426 = vmatprep.subr.bf16.mxu1 %v2639_v47  ;;  %v2683_v47 = vld [vmem:[%s3318_s1 + $0x30c] sm:$0xff]  }
  0x6e   : > { %2405 = vmatpush3.bf16.msra.mxu0 %v2640_v48  ;;  %v2689_v48 = vld [vmem:[%s3318_s1 + $0x40c] ss:$0 sps:$4 sm:$0x33]  }
  0x6f   : > { %2406 = vmatprep.subr.bf16.mxu0 %v2642_v50  ;;  %2427 = vmatpush3.bf16.msra.mxu1 %v2641_v51  ;;  %v1526_v50 = vrot.slane %v1512_v44, %v2931_v40  ;;  %v1552_v51 = vshrl.u32 %v1534_v46, 16 }
  0x70   : > { %2428 = vmatprep.subr.bf16.mxu1 %v2643_v53  ;;  %v1769_v53 = vsel %vm562_vm0, %v2689_v48, 0 }
  0x72   : > { %2407 = vmatpush3.bf16.msra.mxu0 %v2644_v54  ;;  %v1549_v54 = vcombine.high %v1534_v46, %v1534_v46 }
  0x73   : > { %2408 = vmatprep.subr.bf16.mxu0 %v2646_v56  ;;  %2429 = vmatpush3.bf16.msra.mxu1 %v2645_v57  ;;  %v1541_v56 = vrot.slane %v1526_v50, %v2931_v40 }
  0x74   : > { %2430 = vmatprep.subr.bf16.mxu1 %v2647_v58  ;;  %v1558_v57 = vshrl.u32 %v1549_v54, 16 }
  0x75   : > { %v1564_v58 = vshrl.u32 %v1541_v56, 16 }
  0x76   : > { %2409 = vmatpush3.bf16.msra.mxu0 %v2648_v59 }
  0x77   : > { %2410 = vmatprep.subr.bf16.mxu0 %v2650_v60  ;;  %2431 = vmatpush3.bf16.msra.mxu1 %v2649_v61 }
  0x78   : > { %2432 = vmatprep.subr.bf16.mxu1 %v2651_v62 }
  0x7a   : > { %2411 = vmatpush3.bf16.msra.mxu0 %v2652_v0 }
  0x7b   : > { %2500 = vmatprep.subr.bf16.mxu0 %v2753_v36  ;;  %2433 = vmatpush3.bf16.msra.mxu1 %v2653_v2 }
  0x7c   : > { %2442 = vmatprep.subr.bf16.mxu1 %v2655_v4 }
  0x7d   : > { %1356 = vmatmul.mubr.bf16.vlgmr.msra.gmra.mxu0 %v1101_v1 }
  0x7e   : > { %2501 = vmatpush3.bf16.msra.mxu0 %v1321_v6  ;;  %2502 = vmatprep.mubr.msk.bf16.mxu0 %vm2754_vm1, %v2753_v36 }
  0x7f   : > { %1396 = vmatmul.mubr.bf16.vlgmr.msra.gmra.mxu1 %v1116_v5  ;;  %2464 = vmatprep.subr.bf16.mxu0 %v2660_v7 }
  0x80   : > { %2443 = vmatpush3.bf16.msra.mxu1 %v2657_v8  ;;  %1803 = vmatprep.mubr.bf16.mxu1 %v1555_v28 }
  0x81   : > { %2444 = vmatprep.subr.bf16.mxu1 %v2658_v10 }
  0x84   : > { %2445 = vmatpush3.bf16.msra.mxu1 %v2659_v11 }
  0x85   : > { %2503 = vmatmul.mubr.msk.bf16.vlgmr.msra.gmra.mxu0 %vm558_vm2, %v1108_v13  ;;  %2446 = vmatprep.subr.bf16.mxu1 %v2661_v12 }
  0x86   : > { %2465 = vmatpush3.bf16.msra.mxu0 %v2662_v14  ;;  %1843 = vmatprep.mubr.bf16.mxu0 %v1561_v32 }
  0x87   : > { %2466 = vmatprep.subr.bf16.mxu0 %v2664_v16 }
  0x88   : > { %2447 = vmatpush3.bf16.msra.mxu1 %v2663_v15 }
  0x89   : > { %2448 = vmatprep.subr.bf16.mxu1 %v2665_v18 }
  0x8a   : > { %2467 = vmatpush3.bf16.msra.mxu0 %v2666_v20 }
  0x8b   : > { %2468 = vmatprep.subr.bf16.mxu0 %v2668_v21 }
  0x8c   : > { %2449 = vmatpush3.bf16.msra.mxu1 %v2667_v23 }
  0x8d   : > { %2450 = vmatprep.subr.bf16.mxu1 %v2669_v24 }
  0x8e   : > { %2469 = vmatpush3.bf16.msra.mxu0 %v2670_v26 }
  0x8f   : > { %2470 = vmatprep.subr.bf16.mxu0 %v2672_v27 }
  0x90   : > { %2451 = vmatpush3.bf16.msra.mxu1 %v2671_v30 }
  0x91   : > { %2452 = vmatprep.subr.bf16.mxu1 %v2673_v31 }
  0x92   : > { %2471 = vmatpush3.bf16.msra.mxu0 %v2674_v33 }
  0x93   : > { %2472 = vmatprep.subr.bf16.mxu0 %v2676_v34 }
  0x94   : > { %2453 = vmatpush3.bf16.msra.mxu1 %v2675_v35 }
  0x95   : > { %2454 = vmatprep.subr.bf16.mxu1 %v2677_v37 }
  0x96   : > { %2473 = vmatpush3.bf16.msra.mxu0 %v2678_v38 }
  0x97   : > { %2474 = vmatprep.subr.bf16.mxu0 %v2680_v39 }
  0x98   : > { %2455 = vmatpush3.bf16.msra.mxu1 %v2679_v41 }
  0x99   : > { %2456 = vmatprep.subr.bf16.mxu1 %v2681_v42 }
  0x9a   : > { %2475 = vmatpush3.bf16.msra.mxu0 %v2682_v43 }
  0x9b   : > { %2476 = vmatprep.subr.bf16.mxu0 %v2685_v45 }
  0x9c   : > { %2457 = vmatpush3.bf16.msra.mxu1 %v2683_v47 }
  0x9d   : > { %2506 = vmatprep.subr.bf16.mxu1 %v2753_v36 }
  0x9e   : > { %2477 = vmatpush3.bf16.msra.mxu0 %v2686_v49 }
  0x9f   : > { %1804 = vmatmul.mubr.bf16.vlgmr.msra.gmra.mxu1 %v1552_v51  ;;  %2478 = vmatprep.subr.bf16.mxu0 %v2687_v52 }
  0xa0   : > { %2507 = vmatpush3.bf16.msra.mxu1 %v1769_v53  ;;  %2508 = vmatprep.mubr.msk.bf16.mxu1 %vm2754_vm1, %v2753_v36 }
  0xa2   : > { %2479 = vmatpush3.bf16.msra.mxu0 %v2688_v55 }
  0xa5   : > { %1844 = vmatmul.mubr.bf16.vlgmr.msra.gmra.mxu0 %v1558_v57 }
  0xa7   : > { %2509 = vmatmul.mubr.msk.bf16.vlgmr.msra.gmra.mxu1 %vm558_vm2, %v1564_v58 }
  0xf5   : > { %v2320_v59 = vpop.f32.mrf.mxu0 }
  0xf6   : > { %v2342_v60 = vpop.f32.mrf.mxu1 }
  0xf7   : > { %v2321_v61 = vpop.f32.mrf.mxu0 }
  0xf8   : > { %v2322_v62 = vadd.f32 %v2321_v61, %v2320_v59  ;;  %v2343_v63 = vpop.f32.mrf.mxu1  ;;  %v171_v61 = vld [vmem:[%s3319_s2] sm:$0x1] }
  0xf9   : > { %v2323_v0 = vpop.f32.mrf.mxu0  ;;  %v2344_v1 = vadd.f32 %v2343_v63, %v2342_v60 }
  0xfa   : > { %v2345_v2 = vpop.f32.mrf.mxu1 }
  0xfb   : > { %v2324_v3 = vpop.f32.mrf.mxu0  ;;  %v641_v40 = vadd.f32 %v2344_v1, %v2322_v62 }
  0xfc   : > { %v2346_v4 = vpop.f32.mrf.mxu1 }
  0xfd   : > { %v680_v5 = vpop.f32.mrf.mxu0 }
  0xfe   : > { %v681_v6 = vadd.f32 %v680_v5, %v641_v40 }
  0xff   : > { %v2492_v36 = vpop.f32.mrf.mxu0 }
 0x101   : > { %v683_v7 = vpop.f32.mrf.mxu0 }
 0x103   : > { %v2493_v8 = vpop.f32.mrf.mxu0 }
 0x116   : > { %v2366_v9 = vpop.f32.mrf.mxu1 }
 0x118   : > { %v2367_v10 = vpop.f32.mrf.mxu1 }
 0x119   : > { %v2368_v11 = vadd.f32 %v2367_v10, %v2366_v9 }
 0x11a   : > { %v2369_v12 = vpop.f32.mrf.mxu1 }
 0x11b   : > { %v925_v13 = vadd.f32 %v2368_v11, %v681_v6 }
 0x11c   : > { %v2370_v14 = vpop.f32.mrf.mxu1 }
 0x11d   : > { %v2388_v15 = vpop.f32.mrf.mxu0 }
 0x11e   : > { %v1004_v16 = vpop.f32.mrf.mxu1 }
 0x11f   : > { %v2389_v17 = vpop.f32.mrf.mxu0 }
 0x120   : > { %v2390_v18 = vadd.f32 %v2389_v17, %v2388_v15  ;;  %v2498_v19 = vpop.f32.mrf.mxu1 }
 0x121   : > { %v2391_v20 = vpop.f32.mrf.mxu0 }
 0x122   : > { %v965_v21 = vadd.f32 %v2390_v18, %v925_v13  ;;  %v1007_v22 = vpop.f32.mrf.mxu1 }
 0x123   : > { %v2392_v23 = vpop.f32.mrf.mxu0 }
 0x124   : > { %v1005_v24 = vadd.f32 %v1004_v16, %v965_v21  ;;  %v2499_v25 = vpop.f32.mrf.mxu1 }
 0x13d   : > { %v2412_v26 = vpop.f32.mrf.mxu0 }
 0x13f   : > { %v2434_v27 = vpop.f32.mrf.mxu1  ;;  %v2413_v28 = vpop.f32.mrf.mxu0 }
 0x140   : > { %v2414_v42 = vadd.f32 %v2413_v28, %v2412_v26 }
 0x141   : > { %v2435_v29 = vpop.f32.mrf.mxu1  ;;  %v2415_v30 = vpop.f32.mrf.mxu0 }
 0x142   : > { %v2436_v43 = vadd.f32 %v2435_v29, %v2434_v27 }
 0x143   : > { %v2437_v31 = vpop.f32.mrf.mxu1  ;;  %v2416_v32 = vpop.f32.mrf.mxu0 }
 0x144   : > { %v1398_v47 = vadd.f32 %v2436_v43, %v2414_v42 }
 0x145   : > { %v2438_v33 = vpop.f32.mrf.mxu1  ;;  %v1437_v34 = vpop.f32.mrf.mxu0 }
 0x146   : > { %v1438_v50 = vadd.f32 %v1437_v34, %v1398_v47 }
 0x147   : > { %v2504_v35 = vpop.f32.mrf.mxu0 }
 0x148   : > { %v1443_v58 = vadd.f32 %v1438_v50, %v1005_v24 }
 0x149   : > { %v1440_v37 = vpop.f32.mrf.mxu0 }
 0x14b   : > { %v2505_v38 = vpop.f32.mrf.mxu0 }
 0x15f   : > { %v2458_v39 = vpop.f32.mrf.mxu1 }
 0x161   : > { %v2459_v41 = vpop.f32.mrf.mxu1 }
 0x162   : > { %v2460_v51 = vadd.f32 %v2459_v41, %v2458_v39 }
 0x163   : > { %v2461_v44 = vpop.f32.mrf.mxu1 }
 0x165   : > { %v2462_v45 = vpop.f32.mrf.mxu1  ;;  %v2480_v46 = vpop.f32.mrf.mxu0 }
 0x167   : > { %v1885_v48 = vpop.f32.mrf.mxu1  ;;  %v2481_v49 = vpop.f32.mrf.mxu0 }
 0x168   : > { %v2482_v52 = vadd.f32 %v2481_v49, %v2480_v46 }
 0x169   : > { %v2510_v53 = vpop.f32.mrf.mxu1  ;;  %v2483_v54 = vpop.f32.mrf.mxu0 }
 0x16a   : > { %v1846_v55 = vadd.f32 %v2482_v52, %v2460_v51 }
 0x16b   : > { %v1888_v56 = vpop.f32.mrf.mxu1  ;;  %v2484_v57 = vpop.f32.mrf.mxu0 }
 0x16c   : > { %v1886_v59 = vadd.f32 %v1885_v48, %v1846_v55 }
 0x16d   : > { %v2511_v60 = vpop.f32.mrf.mxu1 }
 0x16e   : > { %v1891_v62 = vadd.f32 %v1886_v59, %v1443_v58 }
 0x170   : > { %v1892_v63 = vadd.f32 %v1891_v62, %v171_v61 }
 0x172   : > { %1894 = vst.msk [vmem:[%s163_s9] sm:$0x1] %vm1893_vm3, %v1892_v63 }
 0x173   : > { %2703 = shalt.err (!%p2700_p3)
}
 0x174   : > { %s2704_s27 = scalar_lea.hbm %s1906_s19, 16  ;;  %s2708_s30 = scalar_lea.hbm %s3320_s3, 32 }
 0x175   : > { %p2705_p4 = scmp.ne.s32.totalorder %s1906_s19, %s2704_s27  ;;  %p2709_p9 = scmp.lt.s32.totalorder %s1906_s19, %s3320_s3 }
 0x176   : > { %p2710_p10 = scmp.lt.s32.totalorder %s2708_s30, %s2704_s27 }
 0x177   : > { %p2706_p7 = pnand %p2705_p4, %p2814_p5 }
 0x178   : > { %p2711_p11 = por %p2710_p10, %p2709_p9 }
 0x179   : > { %p2707_p8 = pneg %p2706_p7 }
 0x17b   : > { %p2712_p12 = pnand %p2711_p11, %p2707_p8 }
 0x17d   : > { %2715 = shalt.err (!%p2712_p12)
}
 0x17e   : > { %2513 = dma.vmem_to_hbm [thread:$0]  (%p2814_p5), %s1909_s10, 16, %s1906_s19, %s1896_s20  }
 0x17f PF: > { %p2519_p13 = scmp.ge.s32.totalorder %s2750_s15, 2  ;;  %s1920_s6 = sand.u32 1, %s2738_s12  }
 0x180   : > { %s1921_s7 = scalar_lea.sflag [#allocation3], %s1920_s6 }
 0x181   : > { %p2516_p0 = pnand %p2519_p13, %p2818_p6 }
 0x183   : > { %p2517_p1 = pneg %p2516_p0 }
 0x185   : > { %2733 = dma.done.wait (%p2517_p1), %s1921_s7, 16  }
 0x186   : > { %2735 = vsyncadd (%p2517_p1), %s1921_s7, 4294967280  ;;  %p13_p2 = scmp.ge.s32.totalorder %s2801_s18, 4   ;;  %s3323_s12 = smov %s2742_s13 }
 0x187   : > { %s3324_s13 = smov %s2746_s14  ;;  %s3325_s14 = smov %s2812_s21 }
 0x188   : > { %s3326_s15 = smov %s2801_s18  ;;  %15 = sbr.rel (!%p13_p2) target bundleno = 3 (0x3), region = 71 }
 0x18d   :  { %1925 = vsyncpa [#allocation3], 1 }
 0x18e   :  { %1927 = vsyncpa [#allocation3 + $0x1], 1 }

</bundles_post_ra>
